<compile_context>
chip_gen: v5e
topology: v5e:2x2
jax: 0.10.0
libtpu: 0.0.40
codegen_flags: <defaults>
</compile_context>

<pallas_src>
import functools
import math

import numpy as np
import jax
import jax.numpy as jnp
from jax.experimental import pallas as pl
from jax.experimental.pallas import tpu as pltpu


# -----------------------------------------------------------------------------
# Fused forward kernel
# -----------------------------------------------------------------------------
def _cvae_fused_kernel(
    # data / constants
    x_ref, y_ref, eps_z_ref, eps_x_ref, abias_ref,
    # condition front-end (rfft / unfold folded into weights)
    wloc_ref, in_b_ref, wemb_ref, emb_b_ref,
    # EncoderLayer_selfattn
    wqkv_ref, wfc_ref, ln1_g_ref, ln1_b_ref,
    ffn_w1_ref, ffn_b1_ref, ffn_w2_ref, ffn_b2_ref,
    ln2_g_ref, ln2_b_ref, out_w_ref, out_b_ref,
    # encoder MLP
    enc0_w_ref, enc0_b_ref, enc1_w_ref, enc1_b_ref,
    fc_muvar_w_ref, fc_muvar_b_ref,
    # decoder MLP
    dec_in_w_ref, dec_in_b_ref, dec0_w_ref, dec0_b_ref,
    dec1_w_ref, dec1_b_ref, fc_muvarx_w_ref, fc_muvarx_b_ref,
    # outputs
    ox_ref, oz_ref, oloss_ref,
    # scratch
    enc_scr,
    *, B, W, L, d_model, H, dk, cond, latent, ln_eps):

  f32 = jnp.float32

  def mm(a, b):
    return jnp.dot(a, b, preferred_element_type=f32)

  def softplus(v):  # torch.nn.Softplus (threshold=20)
    return jnp.where(v > 20.0, v, jnp.log(1.0 + jnp.exp(jnp.minimum(v, 20.0))))

  def layernorm(v, g, b):
    mean = jnp.mean(v, axis=-1, keepdims=True)
    var = jnp.mean((v - mean) ** 2, axis=-1, keepdims=True)
    return (v - mean) * jax.lax.rsqrt(var + ln_eps) * g + b

  x = x_ref[...]                                            # (B, W)

  # ---------------- get_conditon: global branch (rfft folded in wemb) --------
  f_global = jnp.tanh(mm(x, wemb_ref[...]) + emb_b_ref[...])   # (B, cond)

  # ---------------- get_conditon: local branch -------------------------------
  # unfold(K, stride) + rfft + in_linear folded per position into wloc blocks.
  # Rows of `enc` are l-major: row r = l*B + b.
  in_b = in_b_ref[...]
  for l in range(L):
    part = jnp.tanh(mm(x, wloc_ref[:, l * d_model:(l + 1) * d_model]) + in_b)
    enc_scr[l * B:(l + 1) * B, :] = part
  enc = enc_scr[...]                                        # (L*B, d_model)

  # ---------------- EncoderLayer_selfattn (post-LN, no qkv/fc bias) ----------
  residual = enc
  qkv = mm(enc, wqkv_ref[...])                              # (L*B, 3*H*dk)
  scale = 1.0 / math.sqrt(dk)
  abias = abias_ref[...]                                    # 0 same batch / -1e30
  attn_fc = jnp.zeros((L * B, d_model), f32)
  for h in range(H):
    q_h = qkv[:, h * dk:(h + 1) * dk]
    k_h = qkv[:, (H + h) * dk:(H + h + 1) * dk]
    v_h = qkv[:, (2 * H + h) * dk:(2 * H + h + 1) * dk]
    s = mm(q_h, k_h.T) * scale + abias                      # (L*B, L*B)
    s = s - jnp.max(s, axis=-1, keepdims=True)
    p = jnp.exp(s)
    p = p / jnp.sum(p, axis=-1, keepdims=True)
    o_h = mm(p, v_h)                                        # (L*B, dk)
    attn_fc = attn_fc + mm(o_h, wfc_ref[h * dk:(h + 1) * dk, :])
  enc = layernorm(attn_fc + residual, ln1_g_ref[...], ln1_b_ref[...])

  residual = enc
  ffn = jnp.maximum(mm(enc, ffn_w1_ref[...]) + ffn_b1_ref[...], 0.0)
  ffn = mm(ffn, ffn_w2_ref[...]) + ffn_b2_ref[...]
  enc = layernorm(ffn + residual, ln2_g_ref[...], ln2_b_ref[...])

  # out_linear only needed for the last position (= the last B rows, l-major).
  enc_last = enc[(L - 1) * B:L * B, :]                      # (B, d_model)
  f_local = jnp.tanh(mm(enc_last, out_w_ref[...]) + out_b_ref[...])  # (B, cond)
  # TODO(synk): self.dropout(condition) is an eval-mode identity here.

  # ---------------- encode (concat folded into row-split weights) ------------
  hid = jnp.tanh(mm(x, enc0_w_ref[0:W, :])
                 + mm(f_global, enc0_w_ref[W:W + cond, :])
                 + mm(f_local, enc0_w_ref[W + cond:W + 2 * cond, :])
                 + enc0_b_ref[...])
  hid = jnp.tanh(mm(hid, enc1_w_ref[...]) + enc1_b_ref[...])
  muvar = mm(hid, fc_muvar_w_ref[...]) + fc_muvar_b_ref[...]          # (B, 2*latent)
  mu = muvar[:, 0:latent]
  var = softplus(muvar[:, latent:2 * latent])

  # ---------------- reparameterize -------------------------------------------
  z = eps_z_ref[...] * jnp.sqrt(1e-7 + var) + mu

  # ---------------- decode ----------------------------------------------------
  dec = (mm(z, dec_in_w_ref[0:latent, :])
         + mm(f_global, dec_in_w_ref[latent:latent + cond, :])
         + mm(f_local, dec_in_w_ref[latent + cond:latent + 2 * cond, :])
         + dec_in_b_ref[...])
  dec = jnp.tanh(mm(dec, dec0_w_ref[...]) + dec0_b_ref[...])
  dec = jnp.tanh(mm(dec, dec1_w_ref[...]) + dec1_b_ref[...])          # (B, W)
  muvarx = mm(dec, fc_muvarx_w_ref[...]) + fc_muvarx_b_ref[...]       # (B, 2W)
  mu_x = muvarx[:, 0:W]
  var_x = softplus(muvarx[:, W:2 * W])

  rec_x = eps_x_ref[...] * jnp.sqrt(1e-7 + var_x) + mu_x

  # ---------------- loss (loss_type == 'C') -----------------------------------
  y = y_ref[...]
  # +1e-7 inside log guards against softplus underflow (matches reparam eps).
  recon_per = 0.5 * jnp.mean(
      y * (jnp.log(var_x + 1e-7) + (x - mu_x) ** 2 / var_x),
      axis=1, keepdims=True)                                # (B, 1)
  recon = jnp.mean(recon_per, axis=0, keepdims=True)        # (1, 1)
  m = jnp.sum(y, axis=1, keepdims=True) / float(W)          # (B, 1) -> broadcast
  kld_per = 0.5 * jnp.mean(
      m * z ** 2 - jnp.log(var + 1e-7) - (z - mu) ** 2 / var,
      axis=1, keepdims=True)
  kld = jnp.mean(kld_per, axis=0, keepdims=True)

  # ---------------- packed outputs (only final results touch HBM) -------------
  ox_ref[:, 0:W] = mu_x
  ox_ref[:, W:2 * W] = var_x
  ox_ref[:, 2 * W:3 * W] = rec_x
  oz_ref[:, 0:latent] = mu
  oz_ref[:, latent:2 * latent] = var
  oloss_ref[...] = recon + kld


# -----------------------------------------------------------------------------
# Parameters (deterministic, synthetic; rfft / unfold folded host-side)
# -----------------------------------------------------------------------------
def _rfft_matrix(n):
  """Real matrix F with x @ F == concat(rfft(x).real, rfft(x).imag)."""
  t = np.arange(n)[:, None].astype(np.float64)
  k = np.arange(n // 2 + 1)[None, :].astype(np.float64)
  ang = 2.0 * np.pi * t * k / n
  return np.concatenate([np.cos(ang), -np.sin(ang)], axis=1).astype(np.float32)


def init_params(key, hp):
  W = hp["window"]
  K = hp["kernel_size"]
  S = hp["stride"]
  d_model = hp["d_model"]
  d_inner = hp["d_inner"]
  H = hp["n_head"]
  dk = d_inner // H
  cond = hp["condition_emb_dim"]
  latent = hp["latent_dim"]
  hidden = hp["hidden_dims"]
  L = (W - K) // S + 1

  state = {"key": key}

  def nxt(shape, scale=0.1):
    state["key"], sub = jax.random.split(state["key"])
    return scale * jax.random.normal(sub, shape, jnp.float32)

  Fg = jnp.asarray(_rfft_matrix(W - 1))          # (W-1, 2*((W-1)//2+1))
  Fl = jnp.asarray(_rfft_matrix(K))              # (K, K+2)

  p = {}
  # global branch: emb = Linear(hp.window -> cond) on rfft(x[:, :-1]); folded.
  emb_w = nxt((2 * ((W - 1) // 2 + 1), cond))
  p["wemb"] = jnp.zeros((W, cond), jnp.float32).at[:W - 1, :].set(Fg @ emb_w)
  p["emb_b"] = nxt((cond,)).reshape(1, cond)

  # local branch: unfold(K, stride S) + rfft + Linear(2+K -> d_model), folded
  # per position l into a (W, d_model) block (last sample zeroed before unfold).
  in_w = nxt((K + 2, d_model))
  blk = Fl @ in_w                                # (K, d_model)
  blocks = []
  for l in range(L):
    sel = np.zeros((K, W), np.float32)
    for j in range(K):
      idx = l * S + j
      if idx != W - 1:
        sel[j, idx] = 1.0
    blocks.append(jnp.asarray(sel).T @ blk)      # (W, d_model)
  p["wloc"] = jnp.concatenate(blocks, axis=1)    # (W, L*d_model)
  p["in_b"] = nxt((d_model,)).reshape(1, d_model)

  # EncoderLayer_selfattn (qkv fused, no qkv/fc bias)
  p["wqkv"] = jnp.concatenate(
      [nxt((d_model, H * dk)), nxt((d_model, H * dk)), nxt((d_model, H * dk))],
      axis=1)
  p["w_fc"] = nxt((H * dk, d_model))
  p["ln1_g"] = jnp.ones((1, d_model), jnp.float32)
  p["ln1_b"] = jnp.zeros((1, d_model), jnp.float32)
  p["ffn_w1"] = nxt((d_model, d_inner))
  p["ffn_b1"] = nxt((d_inner,)).reshape(1, d_inner)
  p["ffn_w2"] = nxt((d_inner, d_model))
  p["ffn_b2"] = nxt((d_model,)).reshape(1, d_model)
  p["ln2_g"] = jnp.ones((1, d_model), jnp.float32)
  p["ln2_b"] = jnp.zeros((1, d_model), jnp.float32)
  p["out_w"] = nxt((d_model, cond))
  p["out_b"] = nxt((cond,)).reshape(1, cond)

  # encoder MLP (fc_mu + fc_var fused along N)
  in_ch = W + 2 * cond
  p["enc0_w"] = nxt((in_ch, hidden[0]))
  p["enc0_b"] = nxt((hidden[0],)).reshape(1, hidden[0])
  p["enc1_w"] = nxt((hidden[0], hidden[1]))
  p["enc1_b"] = nxt((hidden[1],)).reshape(1, hidden[1])
  p["fc_muvar_w"] = jnp.concatenate(
      [nxt((hidden[-1], latent)), nxt((hidden[-1], latent))], axis=1)
  p["fc_muvar_b"] = jnp.concatenate(
      [nxt((latent,)), nxt((latent,))]).reshape(1, 2 * latent)

  # decoder MLP (fc_mu_x + fc_var_x fused along N)
  p["dec_in_w"] = nxt((latent + 2 * cond, hidden[-1]))
  p["dec_in_b"] = nxt((hidden[-1],)).reshape(1, hidden[-1])
  p["dec0_w"] = nxt((hidden[-1], hidden[0]))
  p["dec0_b"] = nxt((hidden[0],)).reshape(1, hidden[0])
  p["dec1_w"] = nxt((hidden[0], W))
  p["dec1_b"] = nxt((W,)).reshape(1, W)
  p["fc_muvarx_w"] = jnp.concatenate([nxt((W, W)), nxt((W, W))], axis=1)
  p["fc_muvarx_b"] = jnp.concatenate([nxt((W,)), nxt((W,))]).reshape(1, 2 * W)
  return p


# -----------------------------------------------------------------------------
# Forward (mode == 'train' / 'valid') -- one fused pallas_call
# -----------------------------------------------------------------------------
def cvae_forward(params, x, y_all, hp, key):
  B = x.shape[0]
  W = hp["window"]
  K = hp["kernel_size"]
  S = hp["stride"]
  d_model = hp["d_model"]
  H = hp["n_head"]
  dk = hp["d_inner"] // H
  cond = hp["condition_emb_dim"]
  latent = hp["latent_dim"]
  L = (W - K) // S + 1

  x_flat = x.reshape(B, W).astype(jnp.float32)
  y_flat = y_all.reshape(B, W).astype(jnp.float32)

  k1, k2 = jax.random.split(key)
  eps_z = jax.random.normal(k1, (B, latent), jnp.float32)
  eps_x = jax.random.normal(k2, (B, W), jnp.float32)

  # Block-diagonal (per-batch) additive attention bias for the l-major
  # (L*B)-row layout: 0 for same batch, -1e30 otherwise.
  bidx = np.arange(L * B) % B
  attn_bias = jnp.asarray(
      np.where(bidx[:, None] == bidx[None, :], 0.0, -1e30).astype(np.float32))

  inputs = [
      x_flat, y_flat, eps_z, eps_x, attn_bias,
      params["wloc"], params["in_b"], params["wemb"], params["emb_b"],
      params["wqkv"], params["w_fc"], params["ln1_g"], params["ln1_b"],
      params["ffn_w1"], params["ffn_b1"], params["ffn_w2"], params["ffn_b2"],
      params["ln2_g"], params["ln2_b"], params["out_w"], params["out_b"],
      params["enc0_w"], params["enc0_b"], params["enc1_w"], params["enc1_b"],
      params["fc_muvar_w"], params["fc_muvar_b"],
      params["dec_in_w"], params["dec_in_b"],
      params["dec0_w"], params["dec0_b"], params["dec1_w"], params["dec1_b"],
      params["fc_muvarx_w"], params["fc_muvarx_b"],
  ]

  kernel = functools.partial(
      _cvae_fused_kernel, B=B, W=W, L=L, d_model=d_model, H=H, dk=dk,
      cond=cond, latent=latent, ln_eps=1e-6)

  def _spec(a):
    return pl.BlockSpec(a.shape, lambda i: (0, 0))

  ox, oz, oloss = pl.pallas_call(
      kernel,
      out_shape=(jax.ShapeDtypeStruct((B, 3 * W), jnp.float32),
                 jax.ShapeDtypeStruct((B, 2 * latent), jnp.float32),
                 jax.ShapeDtypeStruct((1, 1), jnp.float32)),
      grid=(1,),
      in_specs=[_spec(a) for a in inputs],
      out_specs=(pl.BlockSpec((B, 3 * W), lambda i: (0, 0)),
                 pl.BlockSpec((B, 2 * latent), lambda i: (0, 0)),
                 pl.BlockSpec((1, 1), lambda i: (0, 0))),
      scratch_shapes=[pltpu.VMEM((L * B, d_model), jnp.float32)],
      compiler_params=pltpu.CompilerParams(
          dimension_semantics=("arbitrary",)),
  )(*inputs)

  mu_x = ox[:, 0:W]
  var_x = ox[:, W:2 * W]
  rec_x = ox[:, 2 * W:3 * W]
  mu = oz[:, 0:latent]
  var = oz[:, latent:2 * latent]
  loss = oloss[0, 0]

  return (mu_x.reshape(B, 1, W), var_x.reshape(B, 1, W),
          rec_x.reshape(B, 1, W), mu, var, loss)


# -----------------------------------------------------------------------------
if __name__ == "__main__":
  hp = dict(condition_emb_dim=8, d_model=16, d_inner=32, n_head=2,
            kernel_size=4, stride=2, dropout_rate=0.1, window=8,
            latent_dim=8, hidden_dims=[32, 32])
  B = 4

  key = jax.random.PRNGKey(0)
  key, kp, kx, ky, kf = jax.random.split(key, 5)
  params = init_params(kp, hp)

  x = jax.random.normal(kx, (B, 1, hp["window"]), jnp.float32)
  y_all = (jax.random.uniform(ky, (B, hp["window"])) > 0.5).astype(jnp.float32)

  outs = cvae_forward(params, x, y_all, hp, kf)
  outs = jax.block_until_ready(outs)
  mu_x, var_x, rec_x, mu, var, loss = outs

  assert mu_x.shape == (B, 1, hp["window"])
  assert var_x.shape == (B, 1, hp["window"])
  assert rec_x.shape == (B, 1, hp["window"])
  assert mu.shape == (B, hp["latent_dim"])
  assert var.shape == (B, hp["latent_dim"])
  assert bool(jnp.isfinite(loss))
  assert bool(jnp.all(var > 0.0)) and bool(jnp.all(var_x > 0.0))
  print("KERNEL_OK")
</pallas_src>

<mosaic_0001>
module attributes {stable_mosaic.version = 11 : i64} {
  func.func @_cvae_fused_kernel(%arg0: i32, %arg1: memref<4x8xf32, #tpu.memory_space<vmem>>, %arg2: memref<4x8xf32, #tpu.memory_space<vmem>>, %arg3: memref<4x8xf32, #tpu.memory_space<vmem>>, %arg4: memref<4x8xf32, #tpu.memory_space<vmem>>, %arg5: memref<12x12xf32, #tpu.memory_space<vmem>>, %arg6: memref<8x48xf32, #tpu.memory_space<vmem>>, %arg7: memref<1x16xf32, #tpu.memory_space<vmem>>, %arg8: memref<8x8xf32, #tpu.memory_space<vmem>>, %arg9: memref<1x8xf32, #tpu.memory_space<vmem>>, %arg10: memref<16x96xf32, #tpu.memory_space<vmem>>, %arg11: memref<32x16xf32, #tpu.memory_space<vmem>>, %arg12: memref<1x16xf32, #tpu.memory_space<vmem>>, %arg13: memref<1x16xf32, #tpu.memory_space<vmem>>, %arg14: memref<16x32xf32, #tpu.memory_space<vmem>>, %arg15: memref<1x32xf32, #tpu.memory_space<vmem>>, %arg16: memref<32x16xf32, #tpu.memory_space<vmem>>, %arg17: memref<1x16xf32, #tpu.memory_space<vmem>>, %arg18: memref<1x16xf32, #tpu.memory_space<vmem>>, %arg19: memref<1x16xf32, #tpu.memory_space<vmem>>, %arg20: memref<16x8xf32, #tpu.memory_space<vmem>>, %arg21: memref<1x8xf32, #tpu.memory_space<vmem>>, %arg22: memref<24x32xf32, #tpu.memory_space<vmem>>, %arg23: memref<1x32xf32, #tpu.memory_space<vmem>>, %arg24: memref<32x32xf32, #tpu.memory_space<vmem>>, %arg25: memref<1x32xf32, #tpu.memory_space<vmem>>, %arg26: memref<32x16xf32, #tpu.memory_space<vmem>>, %arg27: memref<1x16xf32, #tpu.memory_space<vmem>>, %arg28: memref<24x32xf32, #tpu.memory_space<vmem>>, %arg29: memref<1x32xf32, #tpu.memory_space<vmem>>, %arg30: memref<32x32xf32, #tpu.memory_space<vmem>>, %arg31: memref<1x32xf32, #tpu.memory_space<vmem>>, %arg32: memref<32x8xf32, #tpu.memory_space<vmem>>, %arg33: memref<1x8xf32, #tpu.memory_space<vmem>>, %arg34: memref<8x16xf32, #tpu.memory_space<vmem>>, %arg35: memref<1x16xf32, #tpu.memory_space<vmem>>, %arg36: memref<4x24xf32, #tpu.memory_space<vmem>>, %arg37: memref<4x16xf32, #tpu.memory_space<vmem>>, %arg38: memref<1x1xf32, #tpu.memory_space<vmem>>, %arg39: memref<12x16xf32, #tpu.memory_space<vmem>>) attributes {dimension_semantics = [#tpu.dimension_semantics<arbitrary>], iteration_bounds = array<i64: 1>, scalar_prefetch = 0 : i64, scratch_operands = 1 : i64, tpu.core_type = #tpu.core_type<tc>, window_params = [{pipeline_mode = #tpu.pipeline_mode<synchronous>, transform_indices = @transform_0, window_bounds = array<i64: 4, 8>}, {pipeline_mode = #tpu.pipeline_mode<synchronous>, transform_indices = @transform_1, window_bounds = array<i64: 4, 8>}, {pipeline_mode = #tpu.pipeline_mode<synchronous>, transform_indices = @transform_2, window_bounds = array<i64: 4, 8>}, {pipeline_mode = #tpu.pipeline_mode<synchronous>, transform_indices = @transform_3, window_bounds = array<i64: 4, 8>}, {pipeline_mode = #tpu.pipeline_mode<synchronous>, transform_indices = @transform_4, window_bounds = array<i64: 12, 12>}, {pipeline_mode = #tpu.pipeline_mode<synchronous>, transform_indices = @transform_5, window_bounds = array<i64: 8, 48>}, {pipeline_mode = #tpu.pipeline_mode<synchronous>, transform_indices = @transform_6, window_bounds = array<i64: 1, 16>}, {pipeline_mode = #tpu.pipeline_mode<synchronous>, transform_indices = @transform_7, window_bounds = array<i64: 8, 8>}, {pipeline_mode = #tpu.pipeline_mode<synchronous>, transform_indices = @transform_8, window_bounds = array<i64: 1, 8>}, {pipeline_mode = #tpu.pipeline_mode<synchronous>, transform_indices = @transform_9, window_bounds = array<i64: 16, 96>}, {pipeline_mode = #tpu.pipeline_mode<synchronous>, transform_indices = @transform_10, window_bounds = array<i64: 32, 16>}, {pipeline_mode = #tpu.pipeline_mode<synchronous>, transform_indices = @transform_11, window_bounds = array<i64: 1, 16>}, {pipeline_mode = #tpu.pipeline_mode<synchronous>, transform_indices = @transform_12, window_bounds = array<i64: 1, 16>}, {pipeline_mode = #tpu.pipeline_mode<synchronous>, transform_indices = @transform_13, window_bounds = array<i64: 16, 32>}, {pipeline_mode = #tpu.pipeline_mode<synchronous>, transform_indices = @transform_14, window_bounds = array<i64: 1, 32>}, {pipeline_mode = #tpu.pipeline_mode<synchronous>, transform_indices = @transform_15, window_bounds = array<i64: 32, 16>}, {pipeline_mode = #tpu.pipeline_mode<synchronous>, transform_indices = @transform_16, window_bounds = array<i64: 1, 16>}, {pipeline_mode = #tpu.pipeline_mode<synchronous>, transform_indices = @transform_17, window_bounds = array<i64: 1, 16>}, {pipeline_mode = #tpu.pipeline_mode<synchronous>, transform_indices = @transform_18, window_bounds = array<i64: 1, 16>}, {pipeline_mode = #tpu.pipeline_mode<synchronous>, transform_indices = @transform_19, window_bounds = array<i64: 16, 8>}, {pipeline_mode = #tpu.pipeline_mode<synchronous>, transform_indices = @transform_20, window_bounds = array<i64: 1, 8>}, {pipeline_mode = #tpu.pipeline_mode<synchronous>, transform_indices = @transform_21, window_bounds = array<i64: 24, 32>}, {pipeline_mode = #tpu.pipeline_mode<synchronous>, transform_indices = @transform_22, window_bounds = array<i64: 1, 32>}, {pipeline_mode = #tpu.pipeline_mode<synchronous>, transform_indices = @transform_23, window_bounds = array<i64: 32, 32>}, {pipeline_mode = #tpu.pipeline_mode<synchronous>, transform_indices = @transform_24, window_bounds = array<i64: 1, 32>}, {pipeline_mode = #tpu.pipeline_mode<synchronous>, transform_indices = @transform_25, window_bounds = array<i64: 32, 16>}, {pipeline_mode = #tpu.pipeline_mode<synchronous>, transform_indices = @transform_26, window_bounds = array<i64: 1, 16>}, {pipeline_mode = #tpu.pipeline_mode<synchronous>, transform_indices = @transform_27, window_bounds = array<i64: 24, 32>}, {pipeline_mode = #tpu.pipeline_mode<synchronous>, transform_indices = @transform_28, window_bounds = array<i64: 1, 32>}, {pipeline_mode = #tpu.pipeline_mode<synchronous>, transform_indices = @transform_29, window_bounds = array<i64: 32, 32>}, {pipeline_mode = #tpu.pipeline_mode<synchronous>, transform_indices = @transform_30, window_bounds = array<i64: 1, 32>}, {pipeline_mode = #tpu.pipeline_mode<synchronous>, transform_indices = @transform_31, window_bounds = array<i64: 32, 8>}, {pipeline_mode = #tpu.pipeline_mode<synchronous>, transform_indices = @transform_32, window_bounds = array<i64: 1, 8>}, {pipeline_mode = #tpu.pipeline_mode<synchronous>, transform_indices = @transform_33, window_bounds = array<i64: 8, 16>}, {pipeline_mode = #tpu.pipeline_mode<synchronous>, transform_indices = @transform_34, window_bounds = array<i64: 1, 16>}, {pipeline_mode = #tpu.pipeline_mode<synchronous>, transform_indices = @transform_35, window_bounds = array<i64: 4, 24>}, {pipeline_mode = #tpu.pipeline_mode<synchronous>, transform_indices = @transform_36, window_bounds = array<i64: 4, 16>}, {pipeline_mode = #tpu.pipeline_mode<synchronous>, transform_indices = @transform_37, window_bounds = array<i64: 1, 1>}]} {
    %c0 = arith.constant 0 : index
    %c0_0 = arith.constant 0 : index
    %0 = vector.load %arg1[%c0, %c0_0] : memref<4x8xf32, #tpu.memory_space<vmem>>, vector<4x8xf32>
    %c0_1 = arith.constant 0 : index
    %c0_2 = arith.constant 0 : index
    %1 = vector.load %arg8[%c0_1, %c0_2] : memref<8x8xf32, #tpu.memory_space<vmem>>, vector<8x8xf32>
    %cst = arith.constant dense<0.000000e+00> : vector<4x8xf32>
    %2 = tpu.matmul %0, %1, %cst {dimension_numbers = #tpu.dot_dimension_numbers<[1], [0], [0], [1], [0, 0, 1, 1], [], []>} : vector<4x8xf32>, vector<8x8xf32>, vector<4x8xf32> -> vector<4x8xf32>
    %c0_3 = arith.constant 0 : index
    %c0_4 = arith.constant 0 : index
    %3 = vector.load %arg9[%c0_3, %c0_4] : memref<1x8xf32, #tpu.memory_space<vmem>>, vector<1x8xf32>
    %4 = vector.broadcast %3 : vector<1x8xf32> to vector<4x8xf32>
    %5 = arith.addf %2, %4 : vector<4x8xf32>
    %6 = math.tanh %5 : vector<4x8xf32>
    %c0_5 = arith.constant 0 : index
    %c0_6 = arith.constant 0 : index
    %7 = vector.load %arg7[%c0_5, %c0_6] : memref<1x16xf32, #tpu.memory_space<vmem>>, vector<1x16xf32>
    %c0_7 = arith.constant 0 : index
    %c0_8 = arith.constant 0 : index
    %8 = vector.load %arg6[%c0_7, %c0_8] : memref<8x48xf32, #tpu.memory_space<vmem>>, vector<8x16xf32>
    %cst_9 = arith.constant dense<0.000000e+00> : vector<4x16xf32>
    %9 = tpu.matmul %0, %8, %cst_9 {dimension_numbers = #tpu.dot_dimension_numbers<[1], [0], [0], [1], [0, 0, 1, 1], [], []>} : vector<4x8xf32>, vector<8x16xf32>, vector<4x16xf32> -> vector<4x16xf32>
    %10 = vector.broadcast %7 : vector<1x16xf32> to vector<4x16xf32>
    %11 = arith.addf %9, %10 : vector<4x16xf32>
    %12 = math.tanh %11 : vector<4x16xf32>
    %c0_10 = arith.constant 0 : index
    %c0_11 = arith.constant 0 : index
    %13 = vector.load %arg39[%c0_10, %c0_11] : memref<12x16xf32, #tpu.memory_space<vmem>>, vector<4x16xf32>
    tpu.vector_store %arg39[%c0_10, %c0_11], %12 {strides = array<i32>} : memref<12x16xf32, #tpu.memory_space<vmem>>, vector<4x16xf32>,
    %c0_12 = arith.constant 0 : index
    %c16 = arith.constant 16 : index
    %14 = vector.load %arg6[%c0_12, %c16] : memref<8x48xf32, #tpu.memory_space<vmem>>, vector<8x16xf32>
    %cst_13 = arith.constant dense<0.000000e+00> : vector<4x16xf32>
    %15 = tpu.matmul %0, %14, %cst_13 {dimension_numbers = #tpu.dot_dimension_numbers<[1], [0], [0], [1], [0, 0, 1, 1], [], []>} : vector<4x8xf32>, vector<8x16xf32>, vector<4x16xf32> -> vector<4x16xf32>
    %16 = vector.broadcast %7 : vector<1x16xf32> to vector<4x16xf32>
    %17 = arith.addf %15, %16 : vector<4x16xf32>
    %18 = math.tanh %17 : vector<4x16xf32>
    %c4 = arith.constant 4 : index
    %c0_14 = arith.constant 0 : index
    %19 = vector.load %arg39[%c4, %c0_14] : memref<12x16xf32, #tpu.memory_space<vmem>>, vector<4x16xf32>
    tpu.vector_store %arg39[%c4, %c0_14], %18 {strides = array<i32>} : memref<12x16xf32, #tpu.memory_space<vmem>>, vector<4x16xf32>,
    %c0_15 = arith.constant 0 : index
    %c32 = arith.constant 32 : index
    %20 = vector.load %arg6[%c0_15, %c32] : memref<8x48xf32, #tpu.memory_space<vmem>>, vector<8x16xf32>
    %cst_16 = arith.constant dense<0.000000e+00> : vector<4x16xf32>
    %21 = tpu.matmul %0, %20, %cst_16 {dimension_numbers = #tpu.dot_dimension_numbers<[1], [0], [0], [1], [0, 0, 1, 1], [], []>} : vector<4x8xf32>, vector<8x16xf32>, vector<4x16xf32> -> vector<4x16xf32>
    %22 = vector.broadcast %7 : vector<1x16xf32> to vector<4x16xf32>
    %23 = arith.addf %21, %22 : vector<4x16xf32>
    %24 = math.tanh %23 : vector<4x16xf32>
    %c8 = arith.constant 8 : index
    %c0_17 = arith.constant 0 : index
    %25 = vector.load %arg39[%c8, %c0_17] : memref<12x16xf32, #tpu.memory_space<vmem>>, vector<4x16xf32>
    tpu.vector_store %arg39[%c8, %c0_17], %24 {strides = array<i32>} : memref<12x16xf32, #tpu.memory_space<vmem>>, vector<4x16xf32>,
    %c0_18 = arith.constant 0 : index
    %c0_19 = arith.constant 0 : index
    %26 = vector.load %arg39[%c0_18, %c0_19] : memref<12x16xf32, #tpu.memory_space<vmem>>, vector<12x16xf32>
    %c0_20 = arith.constant 0 : index
    %c0_21 = arith.constant 0 : index
    %27 = vector.load %arg10[%c0_20, %c0_21] : memref<16x96xf32, #tpu.memory_space<vmem>>, vector<16x96xf32>
    %cst_22 = arith.constant dense<0.000000e+00> : vector<12x96xf32>
    %28 = tpu.matmul %26, %27, %cst_22 {dimension_numbers = #tpu.dot_dimension_numbers<[1], [0], [0], [1], [0, 0, 1, 1], [], []>} : vector<12x16xf32>, vector<16x96xf32>, vector<12x96xf32> -> vector<12x96xf32>
    %c0_23 = arith.constant 0 : index
    %c0_24 = arith.constant 0 : index
    %29 = vector.load %arg5[%c0_23, %c0_24] : memref<12x12xf32, #tpu.memory_space<vmem>>, vector<12x12xf32>
    %cst_25 = arith.constant 0.000000e+00 : f32
    %30 = vector.broadcast %cst_25 : f32 to vector<12x16xf32>
    %31 = vector.extract_strided_slice %28 {offsets = [0, 0], sizes = [12, 16], strides = [1, 1]} : vector<12x96xf32> to vector<12x16xf32>
    %32 = vector.extract_strided_slice %28 {offsets = [0, 32], sizes = [12, 16], strides = [1, 1]} : vector<12x96xf32> to vector<12x16xf32>
    %33 = vector.extract_strided_slice %28 {offsets = [0, 64], sizes = [12, 16], strides = [1, 1]} : vector<12x96xf32> to vector<12x16xf32>
    %34 = tpu.transpose %32, [1, 0] : vector<12x16xf32> -> vector<16x12xf32>
    %cst_26 = arith.constant dense<0.000000e+00> : vector<12x12xf32>
    %35 = tpu.matmul %31, %34, %cst_26 {dimension_numbers = #tpu.dot_dimension_numbers<[1], [0], [0], [1], [0, 0, 1, 1], [], []>} : vector<12x16xf32>, vector<16x12xf32>, vector<12x12xf32> -> vector<12x12xf32>
    %cst_27 = arith.constant 2.500000e-01 : f32
    %36 = vector.broadcast %cst_27 : f32 to vector<12x12xf32>
    %37 = arith.mulf %35, %36 : vector<12x12xf32>
    %38 = arith.addf %37, %29 : vector<12x12xf32>
    %cst_28 = arith.constant dense<0xFF800000> : vector<12xf32>
    %39 = vector.multi_reduction <maximumf>, %38, %cst_28 [1] : vector<12x12xf32> to vector<12xf32>
    %40 = vector.shape_cast %39 : vector<12xf32> to vector<12x1xf32>
    %41 = vector.broadcast %40 : vector<12x1xf32> to vector<12x12xf32>
    %42 = arith.subf %38, %41 : vector<12x12xf32>
    %43 = math.exp %42 : vector<12x12xf32>
    %cst_29 = arith.constant dense<0.000000e+00> : vector<12xf32>
    %44 = vector.multi_reduction <add>, %43, %cst_29 [1] : vector<12x12xf32> to vector<12xf32>
    %45 = vector.shape_cast %44 : vector<12xf32> to vector<12x1xf32>
    %46 = vector.broadcast %45 : vector<12x1xf32> to vector<12x12xf32>
    %47 = arith.divf %43, %46 : vector<12x12xf32>
    %cst_30 = arith.constant dense<0.000000e+00> : vector<12x16xf32>
    %48 = tpu.matmul %47, %33, %cst_30 {dimension_numbers = #tpu.dot_dimension_numbers<[1], [0], [0], [1], [0, 0, 1, 1], [], []>} : vector<12x12xf32>, vector<12x16xf32>, vector<12x16xf32> -> vector<12x16xf32>
    %c0_31 = arith.constant 0 : index
    %c0_32 = arith.constant 0 : index
    %49 = vector.load %arg11[%c0_31, %c0_32] : memref<32x16xf32, #tpu.memory_space<vmem>>, vector<16x16xf32>
    %cst_33 = arith.constant dense<0.000000e+00> : vector<12x16xf32>
    %50 = tpu.matmul %48, %49, %cst_33 {dimension_numbers = #tpu.dot_dimension_numbers<[1], [0], [0], [1], [0, 0, 1, 1], [], []>} : vector<12x16xf32>, vector<16x16xf32>, vector<12x16xf32> -> vector<12x16xf32>
    %51 = arith.addf %30, %50 : vector<12x16xf32>
    %52 = vector.extract_strided_slice %28 {offsets = [0, 16], sizes = [12, 16], strides = [1, 1]} : vector<12x96xf32> to vector<12x16xf32>
    %53 = vector.extract_strided_slice %28 {offsets = [0, 48], sizes = [12, 16], strides = [1, 1]} : vector<12x96xf32> to vector<12x16xf32>
    %54 = vector.extract_strided_slice %28 {offsets = [0, 80], sizes = [12, 16], strides = [1, 1]} : vector<12x96xf32> to vector<12x16xf32>
    %55 = tpu.transpose %53, [1, 0] : vector<12x16xf32> -> vector<16x12xf32>
    %cst_34 = arith.constant dense<0.000000e+00> : vector<12x12xf32>
    %56 = tpu.matmul %52, %55, %cst_34 {dimension_numbers = #tpu.dot_dimension_numbers<[1], [0], [0], [1], [0, 0, 1, 1], [], []>} : vector<12x16xf32>, vector<16x12xf32>, vector<12x12xf32> -> vector<12x12xf32>
    %cst_35 = arith.constant 2.500000e-01 : f32
    %57 = vector.broadcast %cst_35 : f32 to vector<12x12xf32>
    %58 = arith.mulf %56, %57 : vector<12x12xf32>
    %59 = arith.addf %58, %29 : vector<12x12xf32>
    %cst_36 = arith.constant dense<0xFF800000> : vector<12xf32>
    %60 = vector.multi_reduction <maximumf>, %59, %cst_36 [1] : vector<12x12xf32> to vector<12xf32>
    %61 = vector.shape_cast %60 : vector<12xf32> to vector<12x1xf32>
    %62 = vector.broadcast %61 : vector<12x1xf32> to vector<12x12xf32>
    %63 = arith.subf %59, %62 : vector<12x12xf32>
    %64 = math.exp %63 : vector<12x12xf32>
    %cst_37 = arith.constant dense<0.000000e+00> : vector<12xf32>
    %65 = vector.multi_reduction <add>, %64, %cst_37 [1] : vector<12x12xf32> to vector<12xf32>
    %66 = vector.shape_cast %65 : vector<12xf32> to vector<12x1xf32>
    %67 = vector.broadcast %66 : vector<12x1xf32> to vector<12x12xf32>
    %68 = arith.divf %64, %67 : vector<12x12xf32>
    %cst_38 = arith.constant dense<0.000000e+00> : vector<12x16xf32>
    %69 = tpu.matmul %68, %54, %cst_38 {dimension_numbers = #tpu.dot_dimension_numbers<[1], [0], [0], [1], [0, 0, 1, 1], [], []>} : vector<12x12xf32>, vector<12x16xf32>, vector<12x16xf32> -> vector<12x16xf32>
    %c16_39 = arith.constant 16 : index
    %c0_40 = arith.constant 0 : index
    %70 = vector.load %arg11[%c16_39, %c0_40] : memref<32x16xf32, #tpu.memory_space<vmem>>, vector<16x16xf32>
    %cst_41 = arith.constant dense<0.000000e+00> : vector<12x16xf32>
    %71 = tpu.matmul %69, %70, %cst_41 {dimension_numbers = #tpu.dot_dimension_numbers<[1], [0], [0], [1], [0, 0, 1, 1], [], []>} : vector<12x16xf32>, vector<16x16xf32>, vector<12x16xf32> -> vector<12x16xf32>
    %72 = arith.addf %51, %71 : vector<12x16xf32>
    %73 = arith.addf %72, %26 : vector<12x16xf32>
    %c0_42 = arith.constant 0 : index
    %c0_43 = arith.constant 0 : index
    %74 = vector.load %arg12[%c0_42, %c0_43] : memref<1x16xf32, #tpu.memory_space<vmem>>, vector<1x16xf32>
    %c0_44 = arith.constant 0 : index
    %c0_45 = arith.constant 0 : index
    %75 = vector.load %arg13[%c0_44, %c0_45] : memref<1x16xf32, #tpu.memory_space<vmem>>, vector<1x16xf32>
    %cst_46 = arith.constant dense<0.000000e+00> : vector<12xf32>
    %76 = vector.multi_reduction <add>, %73, %cst_46 [1] : vector<12x16xf32> to vector<12xf32>
    %77 = vector.shape_cast %76 : vector<12xf32> to vector<12x1xf32>
    %cst_47 = arith.constant 1.600000e+01 : f32
    %78 = vector.broadcast %cst_47 : f32 to vector<12x1xf32>
    %79 = arith.divf %77, %78 : vector<12x1xf32>
    %80 = vector.broadcast %79 : vector<12x1xf32> to vector<12x16xf32>
    %81 = arith.subf %73, %80 : vector<12x16xf32>
    %82 = arith.mulf %81, %81 : vector<12x16xf32>
    %cst_48 = arith.constant dense<0.000000e+00> : vector<12xf32>
    %83 = vector.multi_reduction <add>, %82, %cst_48 [1] : vector<12x16xf32> to vector<12xf32>
    %84 = vector.shape_cast %83 : vector<12xf32> to vector<12x1xf32>
    %cst_49 = arith.constant 1.600000e+01 : f32
    %85 = vector.broadcast %cst_49 : f32 to vector<12x1xf32>
    %86 = arith.divf %84, %85 : vector<12x1xf32>
    %87 = vector.broadcast %79 : vector<12x1xf32> to vector<12x16xf32>
    %88 = arith.subf %73, %87 : vector<12x16xf32>
    %cst_50 = arith.constant 9.99999997E-7 : f32
    %89 = vector.broadcast %cst_50 : f32 to vector<12x1xf32>
    %90 = arith.addf %86, %89 : vector<12x1xf32>
    %91 = math.rsqrt %90 : vector<12x1xf32>
    %92 = vector.broadcast %91 : vector<12x1xf32> to vector<12x16xf32>
    %93 = arith.mulf %88, %92 : vector<12x16xf32>
    %94 = vector.broadcast %74 : vector<1x16xf32> to vector<12x16xf32>
    %95 = arith.mulf %93, %94 : vector<12x16xf32>
    %96 = vector.broadcast %75 : vector<1x16xf32> to vector<12x16xf32>
    %97 = arith.addf %95, %96 : vector<12x16xf32>
    %c0_51 = arith.constant 0 : index
    %c0_52 = arith.constant 0 : index
    %98 = vector.load %arg14[%c0_51, %c0_52] : memref<16x32xf32, #tpu.memory_space<vmem>>, vector<16x32xf32>
    %cst_53 = arith.constant dense<0.000000e+00> : vector<12x32xf32>
    %99 = tpu.matmul %97, %98, %cst_53 {dimension_numbers = #tpu.dot_dimension_numbers<[1], [0], [0], [1], [0, 0, 1, 1], [], []>} : vector<12x16xf32>, vector<16x32xf32>, vector<12x32xf32> -> vector<12x32xf32>
    %c0_54 = arith.constant 0 : index
    %c0_55 = arith.constant 0 : index
    %100 = vector.load %arg15[%c0_54, %c0_55] : memref<1x32xf32, #tpu.memory_space<vmem>>, vector<1x32xf32>
    %101 = vector.broadcast %100 : vector<1x32xf32> to vector<12x32xf32>
    %102 = arith.addf %99, %101 : vector<12x32xf32>
    %cst_56 = arith.constant 0.000000e+00 : f32
    %103 = vector.broadcast %cst_56 : f32 to vector<12x32xf32>
    %104 = arith.maximumf %102, %103 : vector<12x32xf32>
    %c0_57 = arith.constant 0 : index
    %c0_58 = arith.constant 0 : index
    %105 = vector.load %arg16[%c0_57, %c0_58] : memref<32x16xf32, #tpu.memory_space<vmem>>, vector<32x16xf32>
    %cst_59 = arith.constant dense<0.000000e+00> : vector<12x16xf32>
    %106 = tpu.matmul %104, %105, %cst_59 {dimension_numbers = #tpu.dot_dimension_numbers<[1], [0], [0], [1], [0, 0, 1, 1], [], []>} : vector<12x32xf32>, vector<32x16xf32>, vector<12x16xf32> -> vector<12x16xf32>
    %c0_60 = arith.constant 0 : index
    %c0_61 = arith.constant 0 : index
    %107 = vector.load %arg17[%c0_60, %c0_61] : memref<1x16xf32, #tpu.memory_space<vmem>>, vector<1x16xf32>
    %108 = vector.broadcast %107 : vector<1x16xf32> to vector<12x16xf32>
    %109 = arith.addf %106, %108 : vector<12x16xf32>
    %110 = arith.addf %109, %97 : vector<12x16xf32>
    %c0_62 = arith.constant 0 : index
    %c0_63 = arith.constant 0 : index
    %111 = vector.load %arg18[%c0_62, %c0_63] : memref<1x16xf32, #tpu.memory_space<vmem>>, vector<1x16xf32>
    %c0_64 = arith.constant 0 : index
    %c0_65 = arith.constant 0 : index
    %112 = vector.load %arg19[%c0_64, %c0_65] : memref<1x16xf32, #tpu.memory_space<vmem>>, vector<1x16xf32>
    %cst_66 = arith.constant dense<0.000000e+00> : vector<12xf32>
    %113 = vector.multi_reduction <add>, %110, %cst_66 [1] : vector<12x16xf32> to vector<12xf32>
    %114 = vector.shape_cast %113 : vector<12xf32> to vector<12x1xf32>
    %cst_67 = arith.constant 1.600000e+01 : f32
    %115 = vector.broadcast %cst_67 : f32 to vector<12x1xf32>
    %116 = arith.divf %114, %115 : vector<12x1xf32>
    %117 = vector.broadcast %116 : vector<12x1xf32> to vector<12x16xf32>
    %118 = arith.subf %110, %117 : vector<12x16xf32>
    %119 = arith.mulf %118, %118 : vector<12x16xf32>
    %cst_68 = arith.constant dense<0.000000e+00> : vector<12xf32>
    %120 = vector.multi_reduction <add>, %119, %cst_68 [1] : vector<12x16xf32> to vector<12xf32>
    %121 = vector.shape_cast %120 : vector<12xf32> to vector<12x1xf32>
    %cst_69 = arith.constant 1.600000e+01 : f32
    %122 = vector.broadcast %cst_69 : f32 to vector<12x1xf32>
    %123 = arith.divf %121, %122 : vector<12x1xf32>
    %124 = vector.broadcast %116 : vector<12x1xf32> to vector<12x16xf32>
    %125 = arith.subf %110, %124 : vector<12x16xf32>
    %cst_70 = arith.constant 9.99999997E-7 : f32
    %126 = vector.broadcast %cst_70 : f32 to vector<12x1xf32>
    %127 = arith.addf %123, %126 : vector<12x1xf32>
    %128 = math.rsqrt %127 : vector<12x1xf32>
    %129 = vector.broadcast %128 : vector<12x1xf32> to vector<12x16xf32>
    %130 = arith.mulf %125, %129 : vector<12x16xf32>
    %131 = vector.broadcast %111 : vector<1x16xf32> to vector<12x16xf32>
    %132 = arith.mulf %130, %131 : vector<12x16xf32>
    %133 = vector.broadcast %112 : vector<1x16xf32> to vector<12x16xf32>
    %134 = arith.addf %132, %133 : vector<12x16xf32>
    %135 = vector.extract_strided_slice %134 {offsets = [8, 0], sizes = [4, 16], strides = [1, 1]} : vector<12x16xf32> to vector<4x16xf32>
    %c0_71 = arith.constant 0 : index
    %c0_72 = arith.constant 0 : index
    %136 = vector.load %arg20[%c0_71, %c0_72] : memref<16x8xf32, #tpu.memory_space<vmem>>, vector<16x8xf32>
    %cst_73 = arith.constant dense<0.000000e+00> : vector<4x8xf32>
    %137 = tpu.matmul %135, %136, %cst_73 {dimension_numbers = #tpu.dot_dimension_numbers<[1], [0], [0], [1], [0, 0, 1, 1], [], []>} : vector<4x16xf32>, vector<16x8xf32>, vector<4x8xf32> -> vector<4x8xf32>
    %c0_74 = arith.constant 0 : index
    %c0_75 = arith.constant 0 : index
    %138 = vector.load %arg21[%c0_74, %c0_75] : memref<1x8xf32, #tpu.memory_space<vmem>>, vector<1x8xf32>
    %139 = vector.broadcast %138 : vector<1x8xf32> to vector<4x8xf32>
    %140 = arith.addf %137, %139 : vector<4x8xf32>
    %141 = math.tanh %140 : vector<4x8xf32>
    %c0_76 = arith.constant 0 : index
    %c0_77 = arith.constant 0 : index
    %142 = vector.load %arg22[%c0_76, %c0_77] : memref<24x32xf32, #tpu.memory_space<vmem>>, vector<8x32xf32>
    %cst_78 = arith.constant dense<0.000000e+00> : vector<4x32xf32>
    %143 = tpu.matmul %0, %142, %cst_78 {dimension_numbers = #tpu.dot_dimension_numbers<[1], [0], [0], [1], [0, 0, 1, 1], [], []>} : vector<4x8xf32>, vector<8x32xf32>, vector<4x32xf32> -> vector<4x32xf32>
    %c8_79 = arith.constant 8 : index
    %c0_80 = arith.constant 0 : index
    %144 = vector.load %arg22[%c8_79, %c0_80] : memref<24x32xf32, #tpu.memory_space<vmem>>, vector<8x32xf32>
    %cst_81 = arith.constant dense<0.000000e+00> : vector<4x32xf32>
    %145 = tpu.matmul %6, %144, %cst_81 {dimension_numbers = #tpu.dot_dimension_numbers<[1], [0], [0], [1], [0, 0, 1, 1], [], []>} : vector<4x8xf32>, vector<8x32xf32>, vector<4x32xf32> -> vector<4x32xf32>
    %146 = arith.addf %143, %145 : vector<4x32xf32>
    %c16_82 = arith.constant 16 : index
    %c0_83 = arith.constant 0 : index
    %147 = vector.load %arg22[%c16_82, %c0_83] : memref<24x32xf32, #tpu.memory_space<vmem>>, vector<8x32xf32>
    %cst_84 = arith.constant dense<0.000000e+00> : vector<4x32xf32>
    %148 = tpu.matmul %141, %147, %cst_84 {dimension_numbers = #tpu.dot_dimension_numbers<[1], [0], [0], [1], [0, 0, 1, 1], [], []>} : vector<4x8xf32>, vector<8x32xf32>, vector<4x32xf32> -> vector<4x32xf32>
    %149 = arith.addf %146, %148 : vector<4x32xf32>
    %c0_85 = arith.constant 0 : index
    %c0_86 = arith.constant 0 : index
    %150 = vector.load %arg23[%c0_85, %c0_86] : memref<1x32xf32, #tpu.memory_space<vmem>>, vector<1x32xf32>
    %151 = vector.broadcast %150 : vector<1x32xf32> to vector<4x32xf32>
    %152 = arith.addf %149, %151 : vector<4x32xf32>
    %153 = math.tanh %152 : vector<4x32xf32>
    %c0_87 = arith.constant 0 : index
    %c0_88 = arith.constant 0 : index
    %154 = vector.load %arg24[%c0_87, %c0_88] : memref<32x32xf32, #tpu.memory_space<vmem>>, vector<32x32xf32>
    %cst_89 = arith.constant dense<0.000000e+00> : vector<4x32xf32>
    %155 = tpu.matmul %153, %154, %cst_89 {dimension_numbers = #tpu.dot_dimension_numbers<[1], [0], [0], [1], [0, 0, 1, 1], [], []>} : vector<4x32xf32>, vector<32x32xf32>, vector<4x32xf32> -> vector<4x32xf32>
    %c0_90 = arith.constant 0 : index
    %c0_91 = arith.constant 0 : index
    %156 = vector.load %arg25[%c0_90, %c0_91] : memref<1x32xf32, #tpu.memory_space<vmem>>, vector<1x32xf32>
    %157 = vector.broadcast %156 : vector<1x32xf32> to vector<4x32xf32>
    %158 = arith.addf %155, %157 : vector<4x32xf32>
    %159 = math.tanh %158 : vector<4x32xf32>
    %c0_92 = arith.constant 0 : index
    %c0_93 = arith.constant 0 : index
    %160 = vector.load %arg26[%c0_92, %c0_93] : memref<32x16xf32, #tpu.memory_space<vmem>>, vector<32x16xf32>
    %cst_94 = arith.constant dense<0.000000e+00> : vector<4x16xf32>
    %161 = tpu.matmul %159, %160, %cst_94 {dimension_numbers = #tpu.dot_dimension_numbers<[1], [0], [0], [1], [0, 0, 1, 1], [], []>} : vector<4x32xf32>, vector<32x16xf32>, vector<4x16xf32> -> vector<4x16xf32>
    %c0_95 = arith.constant 0 : index
    %c0_96 = arith.constant 0 : index
    %162 = vector.load %arg27[%c0_95, %c0_96] : memref<1x16xf32, #tpu.memory_space<vmem>>, vector<1x16xf32>
    %163 = vector.broadcast %162 : vector<1x16xf32> to vector<4x16xf32>
    %164 = arith.addf %161, %163 : vector<4x16xf32>
    %165 = vector.extract_strided_slice %164 {offsets = [0, 0], sizes = [4, 8], strides = [1, 1]} : vector<4x16xf32> to vector<4x8xf32>
    %166 = vector.extract_strided_slice %164 {offsets = [0, 8], sizes = [4, 8], strides = [1, 1]} : vector<4x16xf32> to vector<4x8xf32>
    %cst_97 = arith.constant 2.000000e+01 : f32
    %167 = vector.broadcast %cst_97 : f32 to vector<4x8xf32>
    %168 = arith.cmpf ogt, %166, %167 : vector<4x8xf32>
    %cst_98 = arith.constant 2.000000e+01 : f32
    %169 = vector.broadcast %cst_98 : f32 to vector<4x8xf32>
    %170 = arith.minimumf %166, %169 : vector<4x8xf32>
    %171 = math.exp %170 : vector<4x8xf32>
    %cst_99 = arith.constant 1.000000e+00 : f32
    %172 = vector.broadcast %cst_99 : f32 to vector<4x8xf32>
    %173 = arith.addf %172, %171 : vector<4x8xf32>
    %174 = math.log %173 : vector<4x8xf32>
    %175 = arith.select %168, %166, %174 : vector<4x8xi1>, vector<4x8xf32>
    %c0_100 = arith.constant 0 : index
    %c0_101 = arith.constant 0 : index
    %176 = vector.load %arg3[%c0_100, %c0_101] : memref<4x8xf32, #tpu.memory_space<vmem>>, vector<4x8xf32>
    %cst_102 = arith.constant 1.000000e-07 : f32
    %177 = vector.broadcast %cst_102 : f32 to vector<4x8xf32>
    %178 = arith.addf %177, %175 : vector<4x8xf32>
    %179 = math.sqrt %178 : vector<4x8xf32>
    %180 = arith.mulf %176, %179 : vector<4x8xf32>
    %181 = arith.addf %180, %165 : vector<4x8xf32>
    %c0_103 = arith.constant 0 : index
    %c0_104 = arith.constant 0 : index
    %182 = vector.load %arg28[%c0_103, %c0_104] : memref<24x32xf32, #tpu.memory_space<vmem>>, vector<8x32xf32>
    %cst_105 = arith.constant dense<0.000000e+00> : vector<4x32xf32>
    %183 = tpu.matmul %181, %182, %cst_105 {dimension_numbers = #tpu.dot_dimension_numbers<[1], [0], [0], [1], [0, 0, 1, 1], [], []>} : vector<4x8xf32>, vector<8x32xf32>, vector<4x32xf32> -> vector<4x32xf32>
    %c8_106 = arith.constant 8 : index
    %c0_107 = arith.constant 0 : index
    %184 = vector.load %arg28[%c8_106, %c0_107] : memref<24x32xf32, #tpu.memory_space<vmem>>, vector<8x32xf32>
    %cst_108 = arith.constant dense<0.000000e+00> : vector<4x32xf32>
    %185 = tpu.matmul %6, %184, %cst_108 {dimension_numbers = #tpu.dot_dimension_numbers<[1], [0], [0], [1], [0, 0, 1, 1], [], []>} : vector<4x8xf32>, vector<8x32xf32>, vector<4x32xf32> -> vector<4x32xf32>
    %186 = arith.addf %183, %185 : vector<4x32xf32>
    %c16_109 = arith.constant 16 : index
    %c0_110 = arith.constant 0 : index
    %187 = vector.load %arg28[%c16_109, %c0_110] : memref<24x32xf32, #tpu.memory_space<vmem>>, vector<8x32xf32>
    %cst_111 = arith.constant dense<0.000000e+00> : vector<4x32xf32>
    %188 = tpu.matmul %141, %187, %cst_111 {dimension_numbers = #tpu.dot_dimension_numbers<[1], [0], [0], [1], [0, 0, 1, 1], [], []>} : vector<4x8xf32>, vector<8x32xf32>, vector<4x32xf32> -> vector<4x32xf32>
    %189 = arith.addf %186, %188 : vector<4x32xf32>
    %c0_112 = arith.constant 0 : index
    %c0_113 = arith.constant 0 : index
    %190 = vector.load %arg29[%c0_112, %c0_113] : memref<1x32xf32, #tpu.memory_space<vmem>>, vector<1x32xf32>
    %191 = vector.broadcast %190 : vector<1x32xf32> to vector<4x32xf32>
    %192 = arith.addf %189, %191 : vector<4x32xf32>
    %c0_114 = arith.constant 0 : index
    %c0_115 = arith.constant 0 : index
    %193 = vector.load %arg30[%c0_114, %c0_115] : memref<32x32xf32, #tpu.memory_space<vmem>>, vector<32x32xf32>
    %cst_116 = arith.constant dense<0.000000e+00> : vector<4x32xf32>
    %194 = tpu.matmul %192, %193, %cst_116 {dimension_numbers = #tpu.dot_dimension_numbers<[1], [0], [0], [1], [0, 0, 1, 1], [], []>} : vector<4x32xf32>, vector<32x32xf32>, vector<4x32xf32> -> vector<4x32xf32>
    %c0_117 = arith.constant 0 : index
    %c0_118 = arith.constant 0 : index
    %195 = vector.load %arg31[%c0_117, %c0_118] : memref<1x32xf32, #tpu.memory_space<vmem>>, vector<1x32xf32>
    %196 = vector.broadcast %195 : vector<1x32xf32> to vector<4x32xf32>
    %197 = arith.addf %194, %196 : vector<4x32xf32>
    %198 = math.tanh %197 : vector<4x32xf32>
    %c0_119 = arith.constant 0 : index
    %c0_120 = arith.constant 0 : index
    %199 = vector.load %arg32[%c0_119, %c0_120] : memref<32x8xf32, #tpu.memory_space<vmem>>, vector<32x8xf32>
    %cst_121 = arith.constant dense<0.000000e+00> : vector<4x8xf32>
    %200 = tpu.matmul %198, %199, %cst_121 {dimension_numbers = #tpu.dot_dimension_numbers<[1], [0], [0], [1], [0, 0, 1, 1], [], []>} : vector<4x32xf32>, vector<32x8xf32>, vector<4x8xf32> -> vector<4x8xf32>
    %c0_122 = arith.constant 0 : index
    %c0_123 = arith.constant 0 : index
    %201 = vector.load %arg33[%c0_122, %c0_123] : memref<1x8xf32, #tpu.memory_space<vmem>>, vector<1x8xf32>
    %202 = vector.broadcast %201 : vector<1x8xf32> to vector<4x8xf32>
    %203 = arith.addf %200, %202 : vector<4x8xf32>
    %204 = math.tanh %203 : vector<4x8xf32>
    %c0_124 = arith.constant 0 : index
    %c0_125 = arith.constant 0 : index
    %205 = vector.load %arg34[%c0_124, %c0_125] : memref<8x16xf32, #tpu.memory_space<vmem>>, vector<8x16xf32>
    %cst_126 = arith.constant dense<0.000000e+00> : vector<4x16xf32>
    %206 = tpu.matmul %204, %205, %cst_126 {dimension_numbers = #tpu.dot_dimension_numbers<[1], [0], [0], [1], [0, 0, 1, 1], [], []>} : vector<4x8xf32>, vector<8x16xf32>, vector<4x16xf32> -> vector<4x16xf32>
    %c0_127 = arith.constant 0 : index
    %c0_128 = arith.constant 0 : index
    %207 = vector.load %arg35[%c0_127, %c0_128] : memref<1x16xf32, #tpu.memory_space<vmem>>, vector<1x16xf32>
    %208 = vector.broadcast %207 : vector<1x16xf32> to vector<4x16xf32>
    %209 = arith.addf %206, %208 : vector<4x16xf32>
    %210 = vector.extract_strided_slice %209 {offsets = [0, 0], sizes = [4, 8], strides = [1, 1]} : vector<4x16xf32> to vector<4x8xf32>
    %211 = vector.extract_strided_slice %209 {offsets = [0, 8], sizes = [4, 8], strides = [1, 1]} : vector<4x16xf32> to vector<4x8xf32>
    %cst_129 = arith.constant 2.000000e+01 : f32
    %212 = vector.broadcast %cst_129 : f32 to vector<4x8xf32>
    %213 = arith.cmpf ogt, %211, %212 : vector<4x8xf32>
    %cst_130 = arith.constant 2.000000e+01 : f32
    %214 = vector.broadcast %cst_130 : f32 to vector<4x8xf32>
    %215 = arith.minimumf %211, %214 : vector<4x8xf32>
    %216 = math.exp %215 : vector<4x8xf32>
    %cst_131 = arith.constant 1.000000e+00 : f32
    %217 = vector.broadcast %cst_131 : f32 to vector<4x8xf32>
    %218 = arith.addf %217, %216 : vector<4x8xf32>
    %219 = math.log %218 : vector<4x8xf32>
    %220 = arith.select %213, %211, %219 : vector<4x8xi1>, vector<4x8xf32>
    %c0_132 = arith.constant 0 : index
    %c0_133 = arith.constant 0 : index
    %221 = vector.load %arg4[%c0_132, %c0_133] : memref<4x8xf32, #tpu.memory_space<vmem>>, vector<4x8xf32>
    %cst_134 = arith.constant 1.000000e-07 : f32
    %222 = vector.broadcast %cst_134 : f32 to vector<4x8xf32>
    %223 = arith.addf %222, %220 : vector<4x8xf32>
    %224 = math.sqrt %223 : vector<4x8xf32>
    %225 = arith.mulf %221, %224 : vector<4x8xf32>
    %226 = arith.addf %225, %210 : vector<4x8xf32>
    %c0_135 = arith.constant 0 : index
    %c0_136 = arith.constant 0 : index
    %227 = vector.load %arg2[%c0_135, %c0_136] : memref<4x8xf32, #tpu.memory_space<vmem>>, vector<4x8xf32>
    %cst_137 = arith.constant 1.000000e-07 : f32
    %228 = vector.broadcast %cst_137 : f32 to vector<4x8xf32>
    %229 = arith.addf %220, %228 : vector<4x8xf32>
    %230 = math.log %229 : vector<4x8xf32>
    %231 = arith.subf %0, %210 : vector<4x8xf32>
    %232 = arith.mulf %231, %231 : vector<4x8xf32>
    %233 = arith.divf %232, %220 : vector<4x8xf32>
    %234 = arith.addf %230, %233 : vector<4x8xf32>
    %235 = arith.mulf %227, %234 : vector<4x8xf32>
    %cst_138 = arith.constant dense<0.000000e+00> : vector<4xf32>
    %236 = vector.multi_reduction <add>, %235, %cst_138 [1] : vector<4x8xf32> to vector<4xf32>
    %237 = vector.shape_cast %236 : vector<4xf32> to vector<4x1xf32>
    %cst_139 = arith.constant 8.000000e+00 : f32
    %238 = vector.broadcast %cst_139 : f32 to vector<4x1xf32>
    %239 = arith.divf %237, %238 : vector<4x1xf32>
    %cst_140 = arith.constant 5.000000e-01 : f32
    %240 = vector.broadcast %cst_140 : f32 to vector<4x1xf32>
    %241 = arith.mulf %240, %239 : vector<4x1xf32>
    %cst_141 = arith.constant dense<0.000000e+00> : vector<1xf32>
    %242 = vector.multi_reduction <add>, %241, %cst_141 [0] : vector<4x1xf32> to vector<1xf32>
    %243 = vector.shape_cast %242 : vector<1xf32> to vector<1x1xf32>
    %cst_142 = arith.constant 4.000000e+00 : f32
    %244 = vector.broadcast %cst_142 : f32 to vector<1x1xf32>
    %245 = arith.divf %243, %244 : vector<1x1xf32>
    %cst_143 = arith.constant dense<0.000000e+00> : vector<4xf32>
    %246 = vector.multi_reduction <add>, %227, %cst_143 [1] : vector<4x8xf32> to vector<4xf32>
    %247 = vector.shape_cast %246 : vector<4xf32> to vector<4x1xf32>
    %cst_144 = arith.constant 8.000000e+00 : f32
    %248 = vector.broadcast %cst_144 : f32 to vector<4x1xf32>
    %249 = arith.divf %247, %248 : vector<4x1xf32>
    %250 = arith.mulf %181, %181 : vector<4x8xf32>
    %251 = vector.broadcast %249 : vector<4x1xf32> to vector<4x8xf32>
    %252 = arith.mulf %251, %250 : vector<4x8xf32>
    %cst_145 = arith.constant 1.000000e-07 : f32
    %253 = vector.broadcast %cst_145 : f32 to vector<4x8xf32>
    %254 = arith.addf %175, %253 : vector<4x8xf32>
    %255 = math.log %254 : vector<4x8xf32>
    %256 = arith.subf %252, %255 : vector<4x8xf32>
    %257 = arith.subf %181, %165 : vector<4x8xf32>
    %258 = arith.mulf %257, %257 : vector<4x8xf32>
    %259 = arith.divf %258, %175 : vector<4x8xf32>
    %260 = arith.subf %256, %259 : vector<4x8xf32>
    %cst_146 = arith.constant dense<0.000000e+00> : vector<4xf32>
    %261 = vector.multi_reduction <add>, %260, %cst_146 [1] : vector<4x8xf32> to vector<4xf32>
    %262 = vector.shape_cast %261 : vector<4xf32> to vector<4x1xf32>
    %cst_147 = arith.constant 8.000000e+00 : f32
    %263 = vector.broadcast %cst_147 : f32 to vector<4x1xf32>
    %264 = arith.divf %262, %263 : vector<4x1xf32>
    %cst_148 = arith.constant 5.000000e-01 : f32
    %265 = vector.broadcast %cst_148 : f32 to vector<4x1xf32>
    %266 = arith.mulf %265, %264 : vector<4x1xf32>
    %cst_149 = arith.constant dense<0.000000e+00> : vector<1xf32>
    %267 = vector.multi_reduction <add>, %266, %cst_149 [0] : vector<4x1xf32> to vector<1xf32>
    %268 = vector.shape_cast %267 : vector<1xf32> to vector<1x1xf32>
    %cst_150 = arith.constant 4.000000e+00 : f32
    %269 = vector.broadcast %cst_150 : f32 to vector<1x1xf32>
    %270 = arith.divf %268, %269 : vector<1x1xf32>
    %c0_151 = arith.constant 0 : index
    %c0_152 = arith.constant 0 : index
    %271 = vector.load %arg36[%c0_151, %c0_152] : memref<4x24xf32, #tpu.memory_space<vmem>>, vector<4x8xf32>
    tpu.vector_store %arg36[%c0_151, %c0_152], %210 {strides = array<i32>} : memref<4x24xf32, #tpu.memory_space<vmem>>, vector<4x8xf32>,
    %c0_153 = arith.constant 0 : index
    %c8_154 = arith.constant 8 : index
    %272 = vector.load %arg36[%c0_153, %c8_154] : memref<4x24xf32, #tpu.memory_space<vmem>>, vector<4x8xf32>
    tpu.vector_store %arg36[%c0_153, %c8_154], %220 {strides = array<i32>} : memref<4x24xf32, #tpu.memory_space<vmem>>, vector<4x8xf32>,
    %c0_155 = arith.constant 0 : index
    %c16_156 = arith.constant 16 : index
    %273 = vector.load %arg36[%c0_155, %c16_156] : memref<4x24xf32, #tpu.memory_space<vmem>>, vector<4x8xf32>
    tpu.vector_store %arg36[%c0_155, %c16_156], %226 {strides = array<i32>} : memref<4x24xf32, #tpu.memory_space<vmem>>, vector<4x8xf32>,
    %c0_157 = arith.constant 0 : index
    %c0_158 = arith.constant 0 : index
    %274 = vector.load %arg37[%c0_157, %c0_158] : memref<4x16xf32, #tpu.memory_space<vmem>>, vector<4x8xf32>
    tpu.vector_store %arg37[%c0_157, %c0_158], %165 {strides = array<i32>} : memref<4x16xf32, #tpu.memory_space<vmem>>, vector<4x8xf32>,
    %c0_159 = arith.constant 0 : index
    %c8_160 = arith.constant 8 : index
    %275 = vector.load %arg37[%c0_159, %c8_160] : memref<4x16xf32, #tpu.memory_space<vmem>>, vector<4x8xf32>
    tpu.vector_store %arg37[%c0_159, %c8_160], %175 {strides = array<i32>} : memref<4x16xf32, #tpu.memory_space<vmem>>, vector<4x8xf32>,
    %276 = arith.addf %245, %270 : vector<1x1xf32>
    %c0_161 = arith.constant 0 : index
    %c0_162 = arith.constant 0 : index
    %277 = vector.load %arg38[%c0_161, %c0_162] : memref<1x1xf32, #tpu.memory_space<vmem>>, vector<1x1xf32>
    tpu.vector_store %arg38[%c0_161, %c0_162], %276 {strides = array<i32>} : memref<1x1xf32, #tpu.memory_space<vmem>>, vector<1x1xf32>,
    return
  }
  func.func @transform_0(%arg0: i32) -> (i32, i32) {
    %c0_i32 = arith.constant 0 : i32
    %c0_i32_0 = arith.constant 0 : i32
    %c0_i32_1 = arith.constant 0 : i32
    return %c0_i32, %c0_i32_0 : i32, i32
  }
  func.func @transform_1(%arg0: i32) -> (i32, i32) {
    %c0_i32 = arith.constant 0 : i32
    %c0_i32_0 = arith.constant 0 : i32
    %c0_i32_1 = arith.constant 0 : i32
    return %c0_i32, %c0_i32_0 : i32, i32
  }
  func.func @transform_2(%arg0: i32) -> (i32, i32) {
    %c0_i32 = arith.constant 0 : i32
    %c0_i32_0 = arith.constant 0 : i32
    %c0_i32_1 = arith.constant 0 : i32
    return %c0_i32, %c0_i32_0 : i32, i32
  }
  func.func @transform_3(%arg0: i32) -> (i32, i32) {
    %c0_i32 = arith.constant 0 : i32
    %c0_i32_0 = arith.constant 0 : i32
    %c0_i32_1 = arith.constant 0 : i32
    return %c0_i32, %c0_i32_0 : i32, i32
  }
  func.func @transform_4(%arg0: i32) -> (i32, i32) {
    %c0_i32 = arith.constant 0 : i32
    %c0_i32_0 = arith.constant 0 : i32
    %c0_i32_1 = arith.constant 0 : i32
    return %c0_i32, %c0_i32_0 : i32, i32
  }
  func.func @transform_5(%arg0: i32) -> (i32, i32) {
    %c0_i32 = arith.constant 0 : i32
    %c0_i32_0 = arith.constant 0 : i32
    %c0_i32_1 = arith.constant 0 : i32
    return %c0_i32, %c0_i32_0 : i32, i32
  }
  func.func @transform_6(%arg0: i32) -> (i32, i32) {
    %c0_i32 = arith.constant 0 : i32
    %c0_i32_0 = arith.constant 0 : i32
    %c0_i32_1 = arith.constant 0 : i32
    return %c0_i32, %c0_i32_0 : i32, i32
  }
  func.func @transform_7(%arg0: i32) -> (i32, i32) {
    %c0_i32 = arith.constant 0 : i32
    %c0_i32_0 = arith.constant 0 : i32
    %c0_i32_1 = arith.constant 0 : i32
    return %c0_i32, %c0_i32_0 : i32, i32
  }
  func.func @transform_8(%arg0: i32) -> (i32, i32) {
    %c0_i32 = arith.constant 0 : i32
    %c0_i32_0 = arith.constant 0 : i32
    %c0_i32_1 = arith.constant 0 : i32
    return %c0_i32, %c0_i32_0 : i32, i32
  }
  func.func @transform_9(%arg0: i32) -> (i32, i32) {
    %c0_i32 = arith.constant 0 : i32
    %c0_i32_0 = arith.constant 0 : i32
    %c0_i32_1 = arith.constant 0 : i32
    return %c0_i32, %c0_i32_0 : i32, i32
  }
  func.func @transform_10(%arg0: i32) -> (i32, i32) {
    %c0_i32 = arith.constant 0 : i32
    %c0_i32_0 = arith.constant 0 : i32
    %c0_i32_1 = arith.constant 0 : i32
    return %c0_i32, %c0_i32_0 : i32, i32
  }
  func.func @transform_11(%arg0: i32) -> (i32, i32) {
    %c0_i32 = arith.constant 0 : i32
    %c0_i32_0 = arith.constant 0 : i32
    %c0_i32_1 = arith.constant 0 : i32
    return %c0_i32, %c0_i32_0 : i32, i32
  }
  func.func @transform_12(%arg0: i32) -> (i32, i32) {
    %c0_i32 = arith.constant 0 : i32
    %c0_i32_0 = arith.constant 0 : i32
    %c0_i32_1 = arith.constant 0 : i32
    return %c0_i32, %c0_i32_0 : i32, i32
  }
  func.func @transform_13(%arg0: i32) -> (i32, i32) {
    %c0_i32 = arith.constant 0 : i32
    %c0_i32_0 = arith.constant 0 : i32
    %c0_i32_1 = arith.constant 0 : i32
    return %c0_i32, %c0_i32_0 : i32, i32
  }
  func.func @transform_14(%arg0: i32) -> (i32, i32) {
    %c0_i32 = arith.constant 0 : i32
    %c0_i32_0 = arith.constant 0 : i32
    %c0_i32_1 = arith.constant 0 : i32
    return %c0_i32, %c0_i32_0 : i32, i32
  }
  func.func @transform_15(%arg0: i32) -> (i32, i32) {
    %c0_i32 = arith.constant 0 : i32
    %c0_i32_0 = arith.constant 0 : i32
    %c0_i32_1 = arith.constant 0 : i32
    return %c0_i32, %c0_i32_0 : i32, i32
  }
  func.func @transform_16(%arg0: i32) -> (i32, i32) {
    %c0_i32 = arith.constant 0 : i32
    %c0_i32_0 = arith.constant 0 : i32
    %c0_i32_1 = arith.constant 0 : i32
    return %c0_i32, %c0_i32_0 : i32, i32
  }
  func.func @transform_17(%arg0: i32) -> (i32, i32) {
    %c0_i32 = arith.constant 0 : i32
    %c0_i32_0 = arith.constant 0 : i32
    %c0_i32_1 = arith.constant 0 : i32
    return %c0_i32, %c0_i32_0 : i32, i32
  }
  func.func @transform_18(%arg0: i32) -> (i32, i32) {
    %c0_i32 = arith.constant 0 : i32
    %c0_i32_0 = arith.constant 0 : i32
    %c0_i32_1 = arith.constant 0 : i32
    return %c0_i32, %c0_i32_0 : i32, i32
  }
  func.func @transform_19(%arg0: i32) -> (i32, i32) {
    %c0_i32 = arith.constant 0 : i32
    %c0_i32_0 = arith.constant 0 : i32
    %c0_i32_1 = arith.constant 0 : i32
    return %c0_i32, %c0_i32_0 : i32, i32
  }
  func.func @transform_20(%arg0: i32) -> (i32, i32) {
    %c0_i32 = arith.constant 0 : i32
    %c0_i32_0 = arith.constant 0 : i32
    %c0_i32_1 = arith.constant 0 : i32
    return %c0_i32, %c0_i32_0 : i32, i32
  }
  func.func @transform_21(%arg0: i32) -> (i32, i32) {
    %c0_i32 = arith.constant 0 : i32
    %c0_i32_0 = arith.constant 0 : i32
    %c0_i32_1 = arith.constant 0 : i32
    return %c0_i32, %c0_i32_0 : i32, i32
  }
  func.func @transform_22(%arg0: i32) -> (i32, i32) {
    %c0_i32 = arith.constant 0 : i32
    %c0_i32_0 = arith.constant 0 : i32
    %c0_i32_1 = arith.constant 0 : i32
    return %c0_i32, %c0_i32_0 : i32, i32
  }
  func.func @transform_23(%arg0: i32) -> (i32, i32) {
    %c0_i32 = arith.constant 0 : i32
    %c0_i32_0 = arith.constant 0 : i32
    %c0_i32_1 = arith.constant 0 : i32
    return %c0_i32, %c0_i32_0 : i32, i32
  }
  func.func @transform_24(%arg0: i32) -> (i32, i32) {
    %c0_i32 = arith.constant 0 : i32
    %c0_i32_0 = arith.constant 0 : i32
    %c0_i32_1 = arith.constant 0 : i32
    return %c0_i32, %c0_i32_0 : i32, i32
  }
  func.func @transform_25(%arg0: i32) -> (i32, i32) {
    %c0_i32 = arith.constant 0 : i32
    %c0_i32_0 = arith.constant 0 : i32
    %c0_i32_1 = arith.constant 0 : i32
    return %c0_i32, %c0_i32_0 : i32, i32
  }
  func.func @transform_26(%arg0: i32) -> (i32, i32) {
    %c0_i32 = arith.constant 0 : i32
    %c0_i32_0 = arith.constant 0 : i32
    %c0_i32_1 = arith.constant 0 : i32
    return %c0_i32, %c0_i32_0 : i32, i32
  }
  func.func @transform_27(%arg0: i32) -> (i32, i32) {
    %c0_i32 = arith.constant 0 : i32
    %c0_i32_0 = arith.constant 0 : i32
    %c0_i32_1 = arith.constant 0 : i32
    return %c0_i32, %c0_i32_0 : i32, i32
  }
  func.func @transform_28(%arg0: i32) -> (i32, i32) {
    %c0_i32 = arith.constant 0 : i32
    %c0_i32_0 = arith.constant 0 : i32
    %c0_i32_1 = arith.constant 0 : i32
    return %c0_i32, %c0_i32_0 : i32, i32
  }
  func.func @transform_29(%arg0: i32) -> (i32, i32) {
    %c0_i32 = arith.constant 0 : i32
    %c0_i32_0 = arith.constant 0 : i32
    %c0_i32_1 = arith.constant 0 : i32
    return %c0_i32, %c0_i32_0 : i32, i32
  }
  func.func @transform_30(%arg0: i32) -> (i32, i32) {
    %c0_i32 = arith.constant 0 : i32
    %c0_i32_0 = arith.constant 0 : i32
    %c0_i32_1 = arith.constant 0 : i32
    return %c0_i32, %c0_i32_0 : i32, i32
  }
  func.func @transform_31(%arg0: i32) -> (i32, i32) {
    %c0_i32 = arith.constant 0 : i32
    %c0_i32_0 = arith.constant 0 : i32
    %c0_i32_1 = arith.constant 0 : i32
    return %c0_i32, %c0_i32_0 : i32, i32
  }
  func.func @transform_32(%arg0: i32) -> (i32, i32) {
    %c0_i32 = arith.constant 0 : i32
    %c0_i32_0 = arith.constant 0 : i32
    %c0_i32_1 = arith.constant 0 : i32
    return %c0_i32, %c0_i32_0 : i32, i32
  }
  func.func @transform_33(%arg0: i32) -> (i32, i32) {
    %c0_i32 = arith.constant 0 : i32
    %c0_i32_0 = arith.constant 0 : i32
    %c0_i32_1 = arith.constant 0 : i32
    return %c0_i32, %c0_i32_0 : i32, i32
  }
  func.func @transform_34(%arg0: i32) -> (i32, i32) {
    %c0_i32 = arith.constant 0 : i32
    %c0_i32_0 = arith.constant 0 : i32
    %c0_i32_1 = arith.constant 0 : i32
    return %c0_i32, %c0_i32_0 : i32, i32
  }
  func.func @transform_35(%arg0: i32) -> (i32, i32) {
    %c0_i32 = arith.constant 0 : i32
    %c0_i32_0 = arith.constant 0 : i32
    %c0_i32_1 = arith.constant 0 : i32
    return %c0_i32, %c0_i32_0 : i32, i32
  }
  func.func @transform_36(%arg0: i32) -> (i32, i32) {
    %c0_i32 = arith.constant 0 : i32
    %c0_i32_0 = arith.constant 0 : i32
    %c0_i32_1 = arith.constant 0 : i32
    return %c0_i32, %c0_i32_0 : i32, i32
  }
  func.func @transform_37(%arg0: i32) -> (i32, i32) {
    %c0_i32 = arith.constant 0 : i32
    %c0_i32_0 = arith.constant 0 : i32
    %c0_i32_1 = arith.constant 0 : i32
    return %c0_i32, %c0_i32_0 : i32, i32
  }
}

</mosaic_0001>

<bundles_post_ra>
// kernel: tpu_custom_call.1
= control target key start
LH: loop header
LB: loop body
LE: loop exit
PB: predicated region body
PF: predicated region fallthrough
CT: control target
= control target key end

     0   :  { %s2361_s6 = smov 1   ;;  %s2362_s10 = smov 2   ;;  %s2917_s0 = inlined_call_operand.smem [shape: u32[38], index: -1, kind: input, shape index: {}] }
   0x1   :  { %s2438_s5 = sld [smem:[%s2917_s0]]   ;;  %s2363_s14 = smov 3  }
   0x2   :  { %s2443_s9 = sld [smem:[%s2917_s0 + %s2361_s6]]   ;;  %s2364_s18 = smov 4  }
   0x3   :  { %s2448_s13 = sld [smem:[%s2917_s0 + %s2362_s10]]   ;;  %s2365_s22 = smov 5  }
   0x4   :  { %s2453_s17 = sld [smem:[%s2917_s0 + %s2363_s14]]   ;;  %s2366_s26 = smov 6  }
   0x5   :  { %s2458_s21 = sld [smem:[%s2917_s0 + %s2364_s18]]   ;;  %s2367_s30 = smov 7  }
   0x6   :  { %s2463_s25 = sld [smem:[%s2917_s0 + %s2365_s22]]   ;;  %s2368_s4 = smov 8  }
   0x7   :  { %s2468_s29 = sld [smem:[%s2917_s0 + %s2366_s26]]   ;;  %s2369_s10 = smov 9  }
   0x8   :  { %s2473_s3 = sld [smem:[%s2917_s0 + %s2367_s30]]   ;;  %s2370_s15 = smov 10  }
   0x9   :  { %s2478_s8 = sld [smem:[%s2917_s0 + %s2368_s4]]   ;;  %s2371_s20 = smov 11  }
   0xa   :  { %s2483_s14 = sld [smem:[%s2917_s0 + %s2369_s10]]   ;;  %s2372_s26 = smov 12  }
   0xb   :  { %2934 = sst [smem:[#allocation48_spill]] %s2458_s21  ;;  %s2373_s1 = smov 13  }
   0xc   :  { %s2488_s19 = sld [smem:[%s2917_s0 + %s2370_s15]]   ;;  %s2374_s7 = smov 14  }
   0xd   :  { %s2493_s24 = sld [smem:[%s2917_s0 + %s2371_s20]]   ;;  %s2375_s15 = smov 15  }
   0xe   :  { %s2498_s30 = sld [smem:[%s2917_s0 + %s2372_s26]]   ;;  %s2376_s22 = smov 16  }
   0xf   :  { %s2503_s6 = sld [smem:[%s2917_s0 + %s2373_s1]]   ;;  %s2377_s28 = smov 17  }
  0x10   :  { %2935 = sst [smem:[#allocation49_spill]] %s2483_s14 }
  0x11   :  { %s2508_s12 = sld [smem:[%s2917_s0 + %s2374_s7]]   ;;  %s2378_s7 = smov 18  }
  0x12   :  { %2936 = sst [smem:[#allocation50_spill]] %s2488_s19 }
  0x13   :  { %s2513_s20 = sld [smem:[%s2917_s0 + %s2375_s15]]   ;;  %s2379_s15 = smov 19  }
  0x14   :  { %s2518_s27 = sld [smem:[%s2917_s0 + %s2376_s22]]   ;;  %s2380_s22 = smov 20  }
  0x15   :  { %2937 = sst [smem:[#allocation51_spill]] %s2503_s6 }
  0x16   :  { %s2523_s4 = sld [smem:[%s2917_s0 + %s2377_s28]]   ;;  %s2381_s28 = smov 21  }
  0x17   :  { %s2528_s6 = sld [smem:[%s2917_s0 + %s2378_s7]]   ;;  %s2382_s7 = smov 22  }
  0x18   :  { %s2538_s19 = sld [smem:[%s2917_s0 + %s2380_s22]]   ;;  %s2384_s22 = smov 24  }
  0x19   :  { %2938 = sst [smem:[#allocation52_spill]] %s2513_s20 }
  0x1a   :  { %s2533_s20 = sld [smem:[%s2917_s0 + %s2379_s15]]   ;;  %s2383_s15 = smov 23  }
  0x1b   :  { %s2543_s21 = sld [smem:[%s2917_s0 + %s2381_s28]]   ;;  %s2385_s28 = smov 25  }
  0x1c   :  { %2939 = sst [smem:[#allocation53_spill]] %s2523_s4 }
  0x1d   :  { %2940 = sst [smem:[#allocation54_spill]] %s2528_s6 }
  0x1e   :  { %s2548_s6 = sld [smem:[%s2917_s0 + %s2382_s7]]   ;;  %s2386_s7 = smov 26  }
  0x1f   :  { %s2558_s14 = sld [smem:[%s2917_s0 + %s2384_s22]]   ;;  %s2388_s22 = smov 28  }
  0x20   :  { %2941 = sst [smem:[#allocation55_spill]] %s2533_s20 }
  0x21   :  { %2942 = sst [smem:[#allocation56_spill]] %s2543_s21 }
  0x22   :  { %s2553_s20 = sld [smem:[%s2917_s0 + %s2383_s15]]   ;;  %s2387_s15 = smov 27  }
  0x23   :  { %s2563_s21 = sld [smem:[%s2917_s0 + %s2385_s28]]   ;;  %s2389_s28 = smov 29  }
  0x24   :  { %2943 = sst [smem:[#allocation57_spill]] %s2548_s6 }
  0x25   :  { %s2568_s6 = sld [smem:[%s2917_s0 + %s2386_s7]]   ;;  %s2390_s7 = smov 30  }
  0x26   :  { %s2578_s4 = sld [smem:[%s2917_s0 + %s2388_s22]]   ;;  %s2392_s22 = smov 32  }
  0x28   :  { %2944 = sst [smem:[#allocation58_spill]] %s2553_s20 }
  0x29   :  { %2945 = sst [smem:[#allocation59_spill]] %s2563_s21 }
  0x2a   :  { %s2573_s20 = sld [smem:[%s2917_s0 + %s2387_s15]]   ;;  %s2391_s15 = smov 31  }
  0x2b   :  { %2946 = sst [smem:[#allocation60_spill]] %s2568_s6 }
  0x2c   :  { %2948 = sst [smem:[#allocation62_spill]] %s2578_s4 }
  0x2d   :  { %s2583_s21 = sld [smem:[%s2917_s0 + %s2389_s28]]   ;;  %s2393_s28 = smov 33  }
  0x2e   :  { %s2588_s6 = sld [smem:[%s2917_s0 + %s2390_s7]]   ;;  %s2394_s7 = smov 34  }
  0x2f   :  { %s2598_s4 = sld [smem:[%s2917_s0 + %s2392_s22]]   ;;  %s2396_s22 = smov 36  }
  0x30   :  { %2947 = sst [smem:[#allocation61_spill]] %s2573_s20 }
  0x31   :  { %s2593_s20 = sld [smem:[%s2917_s0 + %s2391_s15]]   ;;  %s2395_s15 = smov 35  }
  0x33   :  { %2949 = sst [smem:[#allocation63_spill]] %s2583_s21 }
  0x34   :  { %2950 = sst [smem:[#allocation64_spill]] %s2588_s6 }
  0x35   :  { %2952 = sst [smem:[#allocation66_spill]] %s2598_s4 }
  0x36   :  { %s2603_s21 = sld [smem:[%s2917_s0 + %s2393_s28]]   ;;  %s2397_s28 = smov 37  }
  0x37   :  { %2951 = sst [smem:[#allocation65_spill]] %s2593_s20 }
  0x38   :  { %s2608_s6 = sld [smem:[%s2917_s0 + %s2394_s7]]  }
  0x39   :  { %s2613_s20 = sld [smem:[%s2917_s0 + %s2395_s15]]  }
  0x3a   :  { %s2618_s4 = sld [smem:[%s2917_s0 + %s2396_s22]]  }
  0x3c   :  { %2953 = sst [smem:[#allocation67_spill]] %s2603_s21 }
  0x3d   :  { %s2623_s21 = sld [smem:[%s2917_s0 + %s2397_s28]]  }
  0x3e   :  { %81 = vsyncpa [#allocation4], 0 }
  0x3f   :  { %82 = vsyncpa [#allocation7], 0 }
  0x40   :  { %83 = vsyncpa [#allocation10], 0 }
  0x41   :  { %84 = vsyncpa [#allocation13], 0 }
  0x42   :  { %85 = vsyncpa [#allocation16], 0 }
  0x43   :  { %86 = vsyncpa [#allocation19], 0 }
  0x44   :  { %87 = vsyncpa [#allocation22], 0 }
  0x45   :  { %88 = vsyncpa [#allocation25], 0 }
  0x46   :  { %89 = vsyncpa [#allocation28], 0 }
  0x47   :  { %90 = vsyncpa [#allocation31], 0 }
  0x48   :  { %91 = vsyncpa [#allocation5], 0  ;;  %s109_s7 = sshll.u32 %s2443_s9, 4  ;;  %s110_s7 = int_to_ptr.hbm [resolvable:$true] %s109_s7 }
  0x49   :  { %92 = vsyncpa [#allocation34], 0  ;;  %s2398_s0 = smov [#allocation6]   ;;  %s131_s11 = sshll.u32 %s2453_s17, 4  ;;  %s132_s11 = int_to_ptr.hbm [resolvable:$true] %s131_s11 }
  0x4a   :  { %s111_s10 = sshll.u32 %s2398_s0, 4  ;;  %s1833_s15 = sshra.s32 %s110_s7, 4  ;;  %s112_s10 = int_to_ptr.vmem [resolvable:$true] %s111_s10  ;;  %s1834_s15 = int_to_ptr.hbm [resolvable:$true] %s1833_s15 }
  0x4b   :  { %s1835_s16 = scalar_lea.hbm %s1834_s15, 4  ;;  %s1837_s18 = scalar_lea.hbm %s2443_s9, 4 }
  0x4c   :  { %p1836_p0 = scmp.ne.s32.totalorder %s1834_s15, %s1835_s16  ;;  %p1838_p1 = scmp.lt.s32.totalorder %s1834_s15, %s2443_s9 }
  0x4d   :  { %p1839_p2 = scmp.lt.s32.totalorder %s1837_s18, %s1835_s16 }
  0x4f   :  { %p1840_p3 = por %p1839_p2, %p1838_p1 }
  0x51   :  { %p1841_p4 = pnand %p1840_p3, %p1836_p0 }
  0x53   :  { %1844 = shalt.err (!%p1841_p4)
}
  0x54   :  { %114 = dma.hbm_to_vmem [thread:$0]  %s110_s7, 64, %s112_s10, [#allocation7]  }
  0x55   :  { %s2399_s22 = smov [#allocation9]   ;;  %s155_s26 = sshll.u32 %s2468_s29, 4  ;;  %s156_s26 = int_to_ptr.hbm [resolvable:$true] %s155_s26 }
  0x56   :  { %s133_s23 = sshll.u32 %s2399_s22, 4  ;;  %s1857_s28 = sshra.s32 %s132_s11, 4  ;;  %s134_s23 = int_to_ptr.vmem [resolvable:$true] %s133_s23  ;;  %s1858_s28 = int_to_ptr.hbm [resolvable:$true] %s1857_s28 }
  0x57   :  { %s1859_s1 = scalar_lea.hbm %s1858_s28, 4  ;;  %s1861_s2 = scalar_lea.hbm %s2453_s17, 4 }
  0x58   :  { %p1860_p5 = scmp.ne.s32.totalorder %s1858_s28, %s1859_s1  ;;  %p1862_p6 = scmp.lt.s32.totalorder %s1858_s28, %s2453_s17 }
  0x59   :  { %p1863_p7 = scmp.lt.s32.totalorder %s1861_s2, %s1859_s1 }
  0x5b   :  { %p1864_p8 = por %p1863_p7, %p1862_p6 }
  0x5d   :  { %p1865_p9 = pnand %p1864_p8, %p1860_p5 }
  0x5f   :  { %1868 = shalt.err (!%p1865_p9)
}
  0x60   :  { %136 = dma.hbm_to_vmem [thread:$0]  %s132_s11, 64, %s134_s23, [#allocation10]  }
  0x61   :  { %s177_s9 = sshll.u32 %s2478_s8, 4  ;;  %s2400_s7 = smov [#allocation12]   ;;  %s178_s9 = int_to_ptr.hbm [resolvable:$true] %s177_s9 }
  0x62   :  { %s157_s0 = sshll.u32 %s2400_s7, 4  ;;  %s1881_s10 = sshra.s32 %s156_s26, 4  ;;  %s158_s0 = int_to_ptr.vmem [resolvable:$true] %s157_s0  ;;  %s1882_s10 = int_to_ptr.hbm [resolvable:$true] %s1881_s10 }
  0x63   :  { %s1883_s15 = scalar_lea.hbm %s1882_s10, 1  ;;  %s1885_s16 = scalar_lea.hbm %s2468_s29, 1 }
  0x64   :  { %p1884_p10 = scmp.ne.s32.totalorder %s1882_s10, %s1883_s15  ;;  %p1886_p11 = scmp.lt.s32.totalorder %s1882_s10, %s2468_s29 }
  0x65   :  { %p1887_p12 = scmp.lt.s32.totalorder %s1885_s16, %s1883_s15 }
  0x67   :  { %p1888_p13 = por %p1887_p12, %p1886_p11 }
  0x69   :  { %p1889_p0 = pnand %p1888_p13, %p1884_p10 }
  0x6b   :  { %1892 = shalt.err (!%p1889_p0)
}
  0x6c   :  { %160 = dma.hbm_to_vmem [thread:$0]  %s156_s26, 16, %s158_s0, [#allocation13]  }
  0x6d   :  { %s2401_s17 = smov [#allocation15]   ;;  %s203_s18 = sshll.u32 %s2498_s30, 4  ;;  %s204_s18 = int_to_ptr.hbm [resolvable:$true] %s203_s18 }
  0x6e   :  { %s179_s11 = sshll.u32 %s2401_s17, 4  ;;  %s1905_s22 = sshra.s32 %s178_s9, 4  ;;  %s180_s11 = int_to_ptr.vmem [resolvable:$true] %s179_s11  ;;  %s1906_s22 = int_to_ptr.hbm [resolvable:$true] %s1905_s22 }
  0x6f   :  { %s1907_s23 = scalar_lea.hbm %s1906_s22, 1  ;;  %s1909_s28 = scalar_lea.hbm %s2478_s8, 1 }
  0x70   :  { %p1908_p1 = scmp.ne.s32.totalorder %s1906_s22, %s1907_s23  ;;  %p1910_p2 = scmp.lt.s32.totalorder %s1906_s22, %s2478_s8 }
  0x71   :  { %p1911_p3 = scmp.lt.s32.totalorder %s1909_s28, %s1907_s23 }
  0x73   :  { %p1912_p4 = por %p1911_p3, %p1910_p2 }
  0x75   :  { %p1913_p5 = pnand %p1912_p4, %p1908_p1 }
  0x77   :  { %1916 = shalt.err (!%p1913_p5)
}
  0x78   :  { %182 = dma.hbm_to_vmem [thread:$0]  %s178_s9, 16, %s180_s11, [#allocation16]  }
  0x79   :  { %s229_s29 = sshll.u32 %s2518_s27, 4  ;;  %s2402_s26 = smov [#allocation18]   ;;  %s230_s29 = int_to_ptr.hbm [resolvable:$true] %s229_s29 }
  0x7a   :  { %s205_s1 = sshll.u32 %s2402_s26, 4  ;;  %s1929_s2 = sshra.s32 %s204_s18, 4  ;;  %s206_s1 = int_to_ptr.vmem [resolvable:$true] %s205_s1  ;;  %s1930_s2 = int_to_ptr.hbm [resolvable:$true] %s1929_s2 }
  0x7b   :  { %s1931_s7 = scalar_lea.hbm %s1930_s2, 1  ;;  %s1933_s0 = scalar_lea.hbm %s2498_s30, 1 }
  0x7c   :  { %p1932_p6 = scmp.ne.s32.totalorder %s1930_s2, %s1931_s7  ;;  %p1934_p7 = scmp.lt.s32.totalorder %s1930_s2, %s2498_s30 }
  0x7d   :  { %p1935_p8 = scmp.lt.s32.totalorder %s1933_s0, %s1931_s7 }
  0x7f   :  { %p1936_p9 = por %p1935_p8, %p1934_p7 }
  0x81   :  { %p1937_p10 = pnand %p1936_p9, %p1932_p6 }
  0x83   :  { %1940 = shalt.err (!%p1937_p10)
}
  0x84   :  { %208 = dma.hbm_to_vmem [thread:$0]  %s204_s18, 16, %s206_s1, [#allocation19]  }
  0x85   :  { %s2403_s8 = smov [#allocation21]   ;;  %s255_s10 = sshll.u32 %s2538_s19, 4  ;;  %s256_s10 = int_to_ptr.hbm [resolvable:$true] %s255_s10 }
  0x86   :  { %s231_s9 = sshll.u32 %s2403_s8, 4  ;;  %s1953_s15 = sshra.s32 %s230_s29, 4  ;;  %s232_s9 = int_to_ptr.vmem [resolvable:$true] %s231_s9  ;;  %s1954_s15 = int_to_ptr.hbm [resolvable:$true] %s1953_s15 }
  0x87   :  { %s1955_s16 = scalar_lea.hbm %s1954_s15, 1  ;;  %s1957_s17 = scalar_lea.hbm %s2518_s27, 1 }
  0x88   :  { %p1956_p11 = scmp.ne.s32.totalorder %s1954_s15, %s1955_s16  ;;  %p1958_p12 = scmp.lt.s32.totalorder %s1954_s15, %s2518_s27 }
  0x89   :  { %p1959_p13 = scmp.lt.s32.totalorder %s1957_s17, %s1955_s16 }
  0x8b   :  { %p1960_p0 = por %p1959_p13, %p1958_p12 }
  0x8d   :  { %p1961_p1 = pnand %p1960_p0, %p1956_p11 }
  0x8f   :  { %1964 = shalt.err (!%p1961_p1)
}
  0x90   :  { %234 = dma.hbm_to_vmem [thread:$0]  %s230_s29, 16, %s232_s9, [#allocation22]  }
  0x91   :  { %s281_s30 = sshll.u32 %s2558_s14, 4  ;;  %s2404_s11 = smov [#allocation24]   ;;  %s282_s30 = int_to_ptr.hbm [resolvable:$true] %s281_s30 }
  0x92   :  { %s257_s18 = sshll.u32 %s2404_s11, 4  ;;  %s1977_s22 = sshra.s32 %s256_s10, 4  ;;  %s258_s18 = int_to_ptr.vmem [resolvable:$true] %s257_s18  ;;  %s1978_s22 = int_to_ptr.hbm [resolvable:$true] %s1977_s22 }
  0x93   :  { %s1979_s23 = scalar_lea.hbm %s1978_s22, 1  ;;  %s1981_s28 = scalar_lea.hbm %s2538_s19, 1 }
  0x94   :  { %p1980_p2 = scmp.ne.s32.totalorder %s1978_s22, %s1979_s23  ;;  %p1982_p3 = scmp.lt.s32.totalorder %s1978_s22, %s2538_s19 }
  0x95   :  { %p1983_p4 = scmp.lt.s32.totalorder %s1981_s28, %s1979_s23 }
  0x97   :  { %p1984_p5 = por %p1983_p4, %p1982_p3 }
  0x99   :  { %p1985_p6 = pnand %p1984_p5, %p1980_p2 }
  0x9b   :  { %1988 = shalt.err (!%p1985_p6)
}
  0x9c   :  { %260 = dma.hbm_to_vmem [thread:$0]  %s256_s10, 16, %s258_s18, [#allocation25]  }
  0x9d   :  { %s2405_s27 = smov [#allocation27]   ;;  %s98_s26 = sshll.u32 %s2438_s5, 4  ;;  %s99_s26 = int_to_ptr.hbm [resolvable:$true] %s98_s26 }
  0x9e   :  { %s283_s29 = sshll.u32 %s2405_s27, 4  ;;  %s2001_s1 = sshra.s32 %s282_s30, 4  ;;  %s284_s29 = int_to_ptr.vmem [resolvable:$true] %s283_s29  ;;  %s2002_s1 = int_to_ptr.hbm [resolvable:$true] %s2001_s1 }
  0x9f   :  { %s2003_s2 = scalar_lea.hbm %s2002_s1, 1  ;;  %s2005_s7 = scalar_lea.hbm %s2558_s14, 1 }
  0xa0   :  { %p2004_p7 = scmp.ne.s32.totalorder %s2002_s1, %s2003_s2  ;;  %p2006_p8 = scmp.lt.s32.totalorder %s2002_s1, %s2558_s14 }
  0xa1   :  { %p2007_p9 = scmp.lt.s32.totalorder %s2005_s7, %s2003_s2 }
  0xa3   :  { %p2008_p10 = por %p2007_p9, %p2006_p8 }
  0xa5   :  { %p2009_p11 = pnand %p2008_p10, %p2004_p7 }
  0xa7   :  { %2012 = shalt.err (!%p2009_p11)
}
  0xa8   :  { %286 = dma.hbm_to_vmem [thread:$0]  %s282_s30, 16, %s284_s29, [#allocation28]  }
  0xa9   :  { %s120_s19 = sshll.u32 %s2448_s13, 4  ;;  %s2406_s0 = smov [#allocation3]   ;;  %s121_s19 = int_to_ptr.hbm [resolvable:$true] %s120_s19 }
  0xaa   :  { %s100_s8 = sshll.u32 %s2406_s0, 4  ;;  %s2025_s9 = sshra.s32 %s99_s26, 4  ;;  %s101_s8 = int_to_ptr.vmem [resolvable:$true] %s100_s8  ;;  %s2026_s9 = int_to_ptr.hbm [resolvable:$true] %s2025_s9 }
  0xab   :  { %s2027_s10 = scalar_lea.hbm %s2026_s9, 4  ;;  %s2029_s15 = scalar_lea.hbm %s2438_s5, 4 }
  0xac   :  { %p2028_p12 = scmp.ne.s32.totalorder %s2026_s9, %s2027_s10  ;;  %p2030_p13 = scmp.lt.s32.totalorder %s2026_s9, %s2438_s5 }
  0xad   :  { %p2031_p0 = scmp.lt.s32.totalorder %s2029_s15, %s2027_s10 }
  0xaf   :  { %p2032_p1 = por %p2031_p0, %p2030_p13 }
  0xb1   :  { %p2033_p2 = pnand %p2032_p1, %p2028_p12 }
  0xb3   :  { %2036 = shalt.err (!%p2033_p2)
}
  0xb4   :  { %103 = dma.hbm_to_vmem [thread:$0]  %s99_s26, 64, %s101_s8, [#allocation4]  }
  0xb5   :  { %s2407_s14 = smov [#allocation8]   ;;  %s144_s17 = sshll.u32 %s2463_s25, 4  ;;  %s145_s17 = int_to_ptr.hbm [resolvable:$true] %s144_s17 }
  0xb6   :  { %s122_s16 = sshll.u32 %s2407_s14, 4  ;;  %s2049_s30 = sshra.s32 %s121_s19, 4  ;;  %s123_s16 = int_to_ptr.vmem [resolvable:$true] %s122_s16  ;;  %s2050_s30 = int_to_ptr.hbm [resolvable:$true] %s2049_s30 }
  0xb7   :  { %s2051_s11 = scalar_lea.hbm %s2050_s30, 4  ;;  %s2053_s18 = scalar_lea.hbm %s2448_s13, 4 }
  0xb8   :  { %p2052_p3 = scmp.ne.s32.totalorder %s2050_s30, %s2051_s11  ;;  %p2054_p4 = scmp.lt.s32.totalorder %s2050_s30, %s2448_s13 }
  0xb9   :  { %p2055_p5 = scmp.lt.s32.totalorder %s2053_s18, %s2051_s11 }
  0xbb   :  { %p2056_p6 = por %p2055_p5, %p2054_p4 }
  0xbd   :  { %p2057_p7 = pnand %p2056_p6, %p2052_p3 }
  0xbf   :  { %2060 = shalt.err (!%p2057_p7)
}
  0xc0   :  { %125 = dma.hbm_to_vmem [thread:$0]  %s121_s19, 64, %s123_s16, [#allocation7]  }
  0xc1   :  { %s166_s5 = sshll.u32 %s2473_s3, 4  ;;  %s2408_s22 = smov [#allocation11]   ;;  %s167_s5 = int_to_ptr.hbm [resolvable:$true] %s166_s5 }
  0xc2   :  { %s146_s23 = sshll.u32 %s2408_s22, 4  ;;  %s2073_s28 = sshra.s32 %s145_s17, 4  ;;  %s147_s23 = int_to_ptr.vmem [resolvable:$true] %s146_s23  ;;  %s2074_s28 = int_to_ptr.hbm [resolvable:$true] %s2073_s28 }
  0xc3   :  { %s2075_s27 = scalar_lea.hbm %s2074_s28, 8  ;;  %s2077_s29 = scalar_lea.hbm %s2463_s25, 8 }
  0xc4   :  { %p2076_p8 = scmp.ne.s32.totalorder %s2074_s28, %s2075_s27  ;;  %p2078_p9 = scmp.lt.s32.totalorder %s2074_s28, %s2463_s25 }
  0xc5   :  { %p2079_p10 = scmp.lt.s32.totalorder %s2077_s29, %s2075_s27 }
  0xc7   :  { %p2080_p11 = por %p2079_p10, %p2078_p9 }
  0xc9   :  { %p2081_p12 = pnand %p2080_p11, %p2076_p8 }
  0xcb   :  { %2084 = shalt.err (!%p2081_p12)
}
  0xcc   :  { %149 = dma.hbm_to_vmem [thread:$0]  %s145_s17, 128, %s147_s23, [#allocation10]  }
  0xcd   :  { %s2409_s13 = smov [#allocation14]   ;;  %s192_s1 = sshll.u32 %s2493_s24, 4  ;;  %s193_s1 = int_to_ptr.hbm [resolvable:$true] %s192_s1 }
  0xce   :  { %s168_s26 = sshll.u32 %s2409_s13, 4  ;;  %s2097_s2 = sshra.s32 %s167_s5, 4  ;;  %s169_s26 = int_to_ptr.vmem [resolvable:$true] %s168_s26  ;;  %s2098_s2 = int_to_ptr.hbm [resolvable:$true] %s2097_s2 }
  0xcf   :  { %s2099_s7 = scalar_lea.hbm %s2098_s2, 8  ;;  %s2101_s19 = scalar_lea.hbm %s2473_s3, 8 }
  0xd0   :  { %p2100_p13 = scmp.ne.s32.totalorder %s2098_s2, %s2099_s7  ;;  %p2102_p0 = scmp.lt.s32.totalorder %s2098_s2, %s2473_s3 }
  0xd1   :  { %p2103_p1 = scmp.lt.s32.totalorder %s2101_s19, %s2099_s7 }
  0xd3   :  { %p2104_p2 = por %p2103_p1, %p2102_p0 }
  0xd5   :  { %p2105_p3 = pnand %p2104_p2, %p2100_p13 }
  0xd7   :  { %2108 = shalt.err (!%p2105_p3)
}
  0xd8   :  { %171 = dma.hbm_to_vmem [thread:$0]  %s167_s5, 128, %s169_s26, [#allocation13]  }
  0xd9   :  { %s216_s25 = sshll.u32 %s2508_s12, 4  ;;  %s2410_s0 = smov [#allocation17]   ;;  %s217_s25 = int_to_ptr.hbm [resolvable:$true] %s216_s25 }
  0xda   :  { %s194_s8 = sshll.u32 %s2410_s0, 4  ;;  %s2121_s9 = sshra.s32 %s193_s1, 4  ;;  %s195_s8 = int_to_ptr.vmem [resolvable:$true] %s194_s8  ;;  %s2122_s9 = int_to_ptr.hbm [resolvable:$true] %s2121_s9 }
  0xdb   :  { %s2123_s10 = scalar_lea.hbm %s2122_s9, 1  ;;  %s2125_s15 = scalar_lea.hbm %s2493_s24, 1 }
  0xdc   :  { %p2124_p4 = scmp.ne.s32.totalorder %s2122_s9, %s2123_s10  ;;  %p2126_p5 = scmp.lt.s32.totalorder %s2122_s9, %s2493_s24 }
  0xdd   :  { %p2127_p6 = scmp.lt.s32.totalorder %s2125_s15, %s2123_s10 }
  0xdf   :  { %p2128_p7 = por %p2127_p6, %p2126_p5 }
  0xe1   :  { %p2129_p8 = pnand %p2128_p7, %p2124_p4 }
  0xe3   :  { %2132 = shalt.err (!%p2129_p8)
}
  0xe4   :  { %197 = dma.hbm_to_vmem [thread:$0]  %s193_s1, 16, %s195_s8, [#allocation16]  }
  0xe5   :  { %s2954_s3 = sld [smem:[#allocation53_spill]]  ;;  %s2411_s14 = smov [#allocation20]  }
  0xe6   :  { %s218_s16 = sshll.u32 %s2411_s14, 4  ;;  %s2145_s30 = sshra.s32 %s217_s25, 4  ;;  %s219_s16 = int_to_ptr.vmem [resolvable:$true] %s218_s16  ;;  %s2146_s30 = int_to_ptr.hbm [resolvable:$true] %s2145_s30 }
  0xe7   :  { %s2147_s11 = scalar_lea.hbm %s2146_s30, 1  ;;  %s2149_s18 = scalar_lea.hbm %s2508_s12, 1 }
  0xe8   :  { %p2148_p9 = scmp.ne.s32.totalorder %s2146_s30, %s2147_s11  ;;  %p2150_p10 = scmp.lt.s32.totalorder %s2146_s30, %s2508_s12 }
  0xe9   :  { %p2151_p11 = scmp.lt.s32.totalorder %s2149_s18, %s2147_s11 }
  0xeb   :  { %s240_s17 = sshll.u32 %s2954_s3, 4  ;;  %p2152_p12 = por %p2151_p11, %p2150_p10  ;;  %s241_s17 = int_to_ptr.hbm [resolvable:$true] %s240_s17 }
  0xed   :  { %p2153_p13 = pnand %p2152_p12, %p2148_p9 }
  0xef   :  { %2156 = shalt.err (!%p2153_p13)
}
  0xf0   :  { %221 = dma.hbm_to_vmem [thread:$0]  %s217_s25, 16, %s219_s16, [#allocation19]  }
  0xf1   :  { %s2955_s24 = sld [smem:[#allocation57_spill]]  ;;  %s2412_s22 = smov [#allocation23]  }
  0xf2   :  { %s242_s23 = sshll.u32 %s2412_s22, 4  ;;  %s2169_s28 = sshra.s32 %s241_s17, 4  ;;  %s243_s23 = int_to_ptr.vmem [resolvable:$true] %s242_s23  ;;  %s2170_s28 = int_to_ptr.hbm [resolvable:$true] %s2169_s28 }
  0xf3   :  { %s2171_s27 = scalar_lea.hbm %s2170_s28, 1  ;;  %s2173_s29 = scalar_lea.hbm %s2954_s3, 1 }
  0xf4   :  { %p2172_p0 = scmp.ne.s32.totalorder %s2170_s28, %s2171_s27  ;;  %p2174_p1 = scmp.lt.s32.totalorder %s2170_s28, %s2954_s3 }
  0xf5   :  { %p2175_p2 = scmp.lt.s32.totalorder %s2173_s29, %s2171_s27 }
  0xf7   :  { %s268_s5 = sshll.u32 %s2955_s24, 4  ;;  %p2176_p3 = por %p2175_p2, %p2174_p1  ;;  %s269_s5 = int_to_ptr.hbm [resolvable:$true] %s268_s5 }
  0xf9   :  { %p2177_p4 = pnand %p2176_p3, %p2172_p0 }
  0xfb   :  { %2180 = shalt.err (!%p2177_p4)
}
  0xfc   :  { %245 = dma.hbm_to_vmem [thread:$0]  %s241_s17, 16, %s243_s23, [#allocation22]  }
  0xfd   :  { %s2956_s12 = sld [smem:[#allocation60_spill]]  ;;  %s2413_s13 = smov [#allocation26]  }
  0xfe   :  { %s270_s26 = sshll.u32 %s2413_s13, 4  ;;  %s2193_s2 = sshra.s32 %s269_s5, 4  ;;  %s271_s26 = int_to_ptr.vmem [resolvable:$true] %s270_s26  ;;  %s2194_s2 = int_to_ptr.hbm [resolvable:$true] %s2193_s2 }
  0xff   :  { %s2195_s7 = scalar_lea.hbm %s2194_s2, 1  ;;  %s2197_s19 = scalar_lea.hbm %s2955_s24, 1 }
 0x100   :  { %p2196_p5 = scmp.ne.s32.totalorder %s2194_s2, %s2195_s7  ;;  %p2198_p6 = scmp.lt.s32.totalorder %s2194_s2, %s2955_s24 }
 0x101   :  { %p2199_p7 = scmp.lt.s32.totalorder %s2197_s19, %s2195_s7 }
 0x103   :  { %s294_s1 = sshll.u32 %s2956_s12, 4  ;;  %p2200_p8 = por %p2199_p7, %p2198_p6  ;;  %s295_s1 = int_to_ptr.hbm [resolvable:$true] %s294_s1 }
 0x105   :  { %p2201_p9 = pnand %p2200_p8, %p2196_p5 }
 0x107   :  { %2204 = shalt.err (!%p2201_p9)
}
 0x108   :  { %273 = dma.hbm_to_vmem [thread:$0]  %s269_s5, 16, %s271_s26, [#allocation25]  }
 0x109   :  { %s2957_s25 = sld [smem:[#allocation62_spill]]  ;;  %s2414_s8 = smov [#allocation29]  }
 0x10a   :  { %s296_s9 = sshll.u32 %s2414_s8, 4  ;;  %s2217_s10 = sshra.s32 %s295_s1, 4  ;;  %s297_s9 = int_to_ptr.vmem [resolvable:$true] %s296_s9  ;;  %s2218_s10 = int_to_ptr.hbm [resolvable:$true] %s2217_s10 }
 0x10b   :  { %s2219_s15 = scalar_lea.hbm %s2218_s10, 1  ;;  %s2221_s3 = scalar_lea.hbm %s2956_s12, 1 }
 0x10c   :  { %p2220_p10 = scmp.ne.s32.totalorder %s2218_s10, %s2219_s15  ;;  %p2222_p11 = scmp.lt.s32.totalorder %s2218_s10, %s2956_s12 }
 0x10d   :  { %p2223_p12 = scmp.lt.s32.totalorder %s2221_s3, %s2219_s15 }
 0x10f   :  { %s307_s0 = sshll.u32 %s2957_s25, 4  ;;  %p2224_p13 = por %p2223_p12, %p2222_p11  ;;  %s308_s0 = int_to_ptr.hbm [resolvable:$true] %s307_s0 }
 0x111   :  { %p2225_p0 = pnand %p2224_p13, %p2220_p10 }
 0x113   :  { %2228 = shalt.err (!%p2225_p0)
}
 0x114   :  { %299 = dma.hbm_to_vmem [thread:$0]  %s295_s1, 16, %s297_s9, [#allocation28]  }
 0x115   :  { %s2415_s14 = smov [#allocation30]   ;;  %s2241_s17 = sshra.s32 %s308_s0, 4  ;;  %s2242_s17 = int_to_ptr.hbm [resolvable:$true] %s2241_s17 }
 0x116   :  { %s309_s16 = sshll.u32 %s2415_s14, 4  ;;  %s2243_s30 = scalar_lea.hbm %s2242_s17, 1  ;;  %s310_s16 = int_to_ptr.vmem [resolvable:$true] %s309_s16 }
 0x117   :  { %p2244_p1 = scmp.ne.s32.totalorder %s2242_s17, %s2243_s30  ;;  %s2245_s11 = scalar_lea.hbm %s2957_s25, 1 }
 0x118   :  { %p2246_p2 = scmp.lt.s32.totalorder %s2242_s17, %s2957_s25  ;;  %p2247_p3 = scmp.lt.s32.totalorder %s2245_s11, %s2243_s30 }
 0x11a   :  { %p2248_p4 = por %p2247_p3, %p2246_p2 }
 0x11c   :  { %p2249_p5 = pnand %p2248_p4, %p2244_p1 }
 0x11e   :  { %2252 = shalt.err (!%p2249_p5)
}
 0x11f   :  { %312 = dma.hbm_to_vmem [thread:$0]  %s308_s0, 16, %s310_s16, [#allocation31]  }
 0x120   :  { %2337 = dma.done.wait [#allocation4], 64  }
 0x121   :  { %2338 = vsyncadd [#allocation4], 4294967232 }
 0x122   :  { %2339 = dma.done.wait [#allocation7], 128  }
 0x123   :  { %2340 = vsyncadd [#allocation7], 4294967168 }
 0x124   :  { %2341 = dma.done.wait [#allocation10], 192  }
 0x125   :  { %2342 = vsyncadd [#allocation10], 4294967104 }
 0x126   :  { %2343 = dma.done.wait [#allocation13], 144  }
 0x127   :  { %2344 = vsyncadd [#allocation13], 4294967152 }
 0x128   :  { %2345 = dma.done.wait [#allocation16], 32  }
 0x129   :  { %2346 = vsyncadd [#allocation16], 4294967264 }
 0x12a   :  { %2347 = dma.done.wait [#allocation19], 32  }
 0x12b   :  { %2348 = vsyncadd [#allocation19], 4294967264 }
 0x12c   :  { %2349 = dma.done.wait [#allocation22], 32  }
 0x12d   :  { %2350 = vsyncadd [#allocation22], 4294967264 }
 0x12e   :  { %2351 = dma.done.wait [#allocation25], 32  }
 0x12f   :  { %2352 = vsyncadd [#allocation25], 4294967264 }
 0x130   :  { %2353 = dma.done.wait [#allocation28], 32  }
 0x131   :  { %2354 = vsyncadd [#allocation28], 4294967264 }
 0x132   :  { %2355 = dma.done.wait [#allocation31], 16  }
 0x133   :  { %2356 = vsyncadd [#allocation31], 4294967280  ;;  %v456_v0 = vld [vmem:[#allocation11] sm:$0xff]  ;;  %s2416_s18 = smov 112   ;;  %s2417_s24 = smov 96   ;;  %vm403_vm0 = vcmask 64512  }
 0x134   :  { %458 = vrot.lane.b32.xlu0 %v456_v0, %s2416_s18  ;;  %448 = vmatpush.msra.mxu1 %v456_v0  ;;  %v2681_v1 = vld [vmem:[#allocation3] sm:$0xf]  ;;  %s2958_s5 = sld [smem:[#allocation49_spill]]  ;;  %v1751_v4 = vld [vmem:[#allocation12] ss:$0 sm:$0xff]  ;;  %vm454_vm1 = vcmask 125952  }
 0x135   :  { %1643 = vmatmul.msk.f32.vlgmr.msra.gmra.mxu1 %vm403_vm0, %v2681_v1  ;;  %v398_v8 = vld [vmem:[#allocation14] sm:$0xff]  ;;  %vm514_vm2 = vcmask 130048   ;;  %s2418_s22 = smov 80   ;;  %s2959_s23 = sld [smem:[#allocation48_spill]]  ;;  %vm587_vm3 = vcmask 97280   ;;  %vm591_vm4 = vcmask 93184  }
 0x136   :  { %422 = vmatpush.msra.mxu0 %v398_v8  ;;  %s2419_s28 = smov 64   ;;  %s2420_s27 = smov 48   ;;  %vm648_vm5 = vcmask 1043456  }
 0x137   :  { %1642 = vmatmul.msk.f32.vlgmr.msra.gmra.mxu0 %vm403_vm0, %v2681_v1  ;;  %s2960_s29 = sld [smem:[#allocation50_spill]]  ;;  %s2422_s8 = smov 120  }
 0x138   :  { %s2961_s12 = sld [smem:[#allocation56_spill]]  ;;  %s2425_s14 = smov 16  }
 0x139   :  { %s2962_s13 = sld [smem:[#allocation51_spill]]  ;;  %s1566_s16 = sshll.u32 %s2618_s4, 4  ;;  %s1567_s16 = int_to_ptr.hbm [resolvable:$true] %s1566_s16 }
 0x13a   :  { %v513_v9 = vld [vmem:[%s2958_s5 + $0x8] sm:$0xff]  ;;  %v512_v10 = vld [vmem:[%s2958_s5] sm:$0xff]  ;;  %s2963_s26 = sld [smem:[#allocation52_spill]]  ;;  %s2426_s17 = smov [#allocation33]  }
 0x13b   :  { %535 = vmatpush.msrb.mxu0 %v513_v9  ;;  %v544_v29 = vld [vmem:[%s2959_s23] sm:$0xff]  ;;  %v545_v38 = vld [vmem:[%s2959_s23 + $0x8] sm:$0xf]  ;;  %s2964_s1 = sld [smem:[#allocation61_spill]]  ;;  %s1564_s30 = sshll.u32 %s2426_s17, 4  ;;  %s1565_s30 = int_to_ptr.vmem [resolvable:$true] %s1564_s30 }
 0x13c   :  { %485 = vrot.lane.b32.xlu0 %v456_v0, %s2417_s24  ;;  %s2965_s2 = sld [smem:[#allocation55_spill]]  ;;  %s2277_s11 = sshra.s32 %s1567_s16, 4  ;;  %s2278_s11 = int_to_ptr.hbm [resolvable:$true] %s2277_s11 }
 0x13d   :  { %536 = vmatpush.msrb.mxu0 %v512_v10  ;;  %s2966_s7 = sld [smem:[#allocation54_spill]]  ;;  %p2282_p7 = scmp.lt.s32.totalorder %s2278_s11, %s2618_s4 }
 0x13e   :  { %s2967_s19 = sld [smem:[#allocation58_spill]] }
 0x13f   :  { %s2968_s25 = sld [smem:[#allocation59_spill]] }
 0x140   :  { %s2969_s0 = sld [smem:[#allocation63_spill]] }
 0x141   :  { %s2970_s9 = sld [smem:[#allocation65_spill]] }
 0x142   :  { %s2971_s10 = sld [smem:[#allocation64_spill]] }
 0x143   :  { %s2972_s15 = sld [smem:[#allocation67_spill]] }
 0x144   :  { %s2973_s3 = sld [smem:[#allocation66_spill]] }
 0x1a6   :  { %v459_v2 = vpop.permute.xlu0 %458 }
 0x1a7   :  { %476 = vmatpush.msra.mxu2 %v459_v2 }
 0x1a8   :  { %1644 = vmatmul.msk.f32.vlgmr.msra.gmra.mxu2 %vm403_vm0, %v2681_v1 }
 0x1ae   :  { %v486_v3 = vpop.permute.xlu0 %485 }
 0x1af   :  { %503 = vmatpush.msra.mxu3 %v486_v3 }
 0x1b0   :  { %1645 = vmatmul.msk.f32.vlgmr.msra.gmra.mxu3 %vm403_vm0, %v2681_v1 }
 0x1b2   :  { %v450_v5 = vpop.f32.mrf.mxu1 }
 0x1b3   :  { %v451_v6 = vadd.f32 %v1751_v4, %v450_v5 }
 0x1b4   :  { %v2704_v19 = vpop.f32.mrf.mxu0 }
 0x1b5   :  { %1767 = vtanh.f32 %v451_v6 }
 0x1bb   :  { %v1768_v7 = vpop.eup %1767 }
 0x1bc   :  { %455 = vst.msk [vmem:[#allocation2] sm:$0xf] %vm454_vm1, %v1768_v7 }
 0x22b   :  { %v478_v11 = vpop.f32.mrf.mxu2 }
 0x22c   :  { %v479_v12 = vadd.f32 %v1751_v4, %v478_v11 }
 0x22e   :  { %1769 = vtanh.f32 %v479_v12 }
 0x233   :  { %v505_v13 = vpop.f32.mrf.mxu3 }
 0x234   :  { %v1770_v14 = vpop.eup %1769  ;;  %v506_v15 = vadd.f32 %v1751_v4, %v505_v13 }
 0x235   :  { %482 = vst.msk [vmem:[#allocation2 + $0x4] sm:$0xf] %vm454_vm1, %v1770_v14 }
 0x236   :  { %1771 = vtanh.f32 %v506_v15 }
 0x23c   :  { %v1772_v16 = vpop.eup %1771  ;;  %v2695_v17 = vld [vmem:[#allocation2] sm:$0xff] }
 0x23d   :  { %509 = vst.msk [vmem:[#allocation2 + $0x8] sm:$0xf] %vm454_vm1, %v1772_v16  ;;  %1646 = vmatmul.msk.f32.vlgmr.msrb.gmra.mxu0 %vm514_vm2, %v2695_v17 }
 0x244   :  { %v2700_v18 = vld [vmem:[#allocation2 + $0x8] sm:$0xf] }
 0x245   :  { %1647 = vmatmul.msk.f32.gmra.mxu0 %vm514_vm2, %v2700_v18 }
 0x2ba   :  { %v2706_v20 = vpop.f32.mrf.mxu0 }
 0x2bb   :  { %676 = vrot.lane.b32.xlu0 %v2706_v20, %s2416_s18 }
 0x2c2   :  { %v2710_v21 = vpop.f32.mrf.mxu0 }
 0x2c3   :  { %682 = vrot.lane.b32.xlu2 %v2710_v21, %s2418_s22  ;;  %550 = vrot.lane.b32.xlu1 %v2710_v21, %s2417_s24 }
 0x2cb   :  { %680 = vrot.lane.b32.xlu2 %v2706_v20, %s2418_s22  ;;  %548 = vrot.lane.b32.xlu1 %v2706_v20, %s2417_s24  ;;  %s2281_s24 = scalar_lea.hbm %s2618_s4, 4 }
 0x2d3   :  { %678 = vrot.lane.b32.xlu1 %v2710_v21, %s2416_s18  ;;  %s2279_s18 = scalar_lea.hbm %s2278_s11, 4 }
 0x2d4   :  { %p2280_p6 = scmp.ne.s32.totalorder %s2278_s11, %s2279_s18  ;;  %p2283_p8 = scmp.lt.s32.totalorder %s2281_s24, %s2279_s18 }
 0x2d6   :  { %p2284_p9 = por %p2283_p8, %p2282_p7 }
 0x2d8   :  { %p2285_p10 = pnand %p2284_p9, %p2280_p6 }
 0x31d   :  { %v683_v22 = vpop.permute.xlu2 %682 }
 0x31e   :  { %1655 = vmatpush.xpose.msk.msrb.mxu3 %vm514_vm2, %v683_v22 }
 0x325   :  { %v681_v23 = vpop.permute.xlu2 %680 }
 0x326   :  { %1656 = vmatpush.xpose.msk.msrb.mxu3 %vm514_vm2, %v681_v23  ;;  %v675_v23 = vld [vmem:[%s2960_s29 + $0x8] sm:$0xff] }
 0x32d   :  { %v677_v24 = vpop.permute.xlu0 %676 }
 0x32e   :  { %1657 = vmatmul.msk.f32.vlgmr.msrb.gmra.mxu3 %vm514_vm2, %v677_v24 }
 0x335   :  { %v551_v25 = vpop.permute.xlu1 %550 }
 0x336   :  { %1648 = vmatpush.xpose.msk.msrb.mxu1 %vm514_vm2, %v551_v25 }
 0x33d   :  { %v549_v26 = vpop.permute.xlu1 %548 }
 0x33e   :  { %1649 = vmatpush.xpose.msk.msrb.mxu1 %vm514_vm2, %v549_v26 }
 0x341   :  { %1650 = vmatmul.msk.f32.vlgmr.msrb.gmra.mxu1 %vm514_vm2, %v2706_v20 }
 0x345   :  { %v679_v27 = vpop.permute.xlu1 %678 }
 0x346   :  { %1658 = vmatmul.msk.f32.gmra.mxu3 %vm514_vm2, %v679_v27 }
 0x349   :  { %1651 = vmatmul.msk.f32.gmra.mxu1 %vm514_vm2, %v2710_v21 }
 0x3b1   :  { %v709_v28 = vpop.f32.mrf.mxu3 }
 0x3b2   :  { %v715_v30 = vmul.f32 0.25, %v709_v28 }
 0x3b4   :  { %v717_v31 = vadd.f32 %v715_v30, %v544_v29 }
 0x3b6   :  { %v719_v32 = vsel %vm587_vm3, %v717_v31, -inf }
 0x3b7   :  { %720 = vmax.xlane.f32.xlu1 %v719_v32 }
 0x3be   :  { %v577_v33 = vpop.f32.mrf.mxu1 }
 0x3bf   :  { %v583_v34 = vmul.f32 0.25, %v577_v33 }
 0x3c1   :  { %v585_v35 = vadd.f32 %v583_v34, %v544_v29 }
 0x3c3   :  { %v588_v36 = vsel %vm587_vm3, %v585_v35, -inf }
 0x3c4   :  { %589 = vmax.xlane.f32.xlu2 %v588_v36 }
 0x3c6   :  { %v580_v37 = vpop.f32.mrf.mxu1 }
 0x3c7   :  { %v584_v39 = vmul.f32 0.25, %v580_v37 }
 0x3c9   :  { %v712_v40 = vpop.f32.mrf.mxu3  ;;  %v586_v41 = vadd.f32 %v584_v39, %v545_v38 }
 0x3ca   :  { %v716_v42 = vmul.f32 0.25, %v712_v40 }
 0x3cb   :  { %v592_v43 = vsel %vm591_vm4, %v586_v41, -inf }
 0x3cc   :  { %593 = vmax.xlane.f32.xlu0 %v592_v43  ;;  %v718_v44 = vadd.f32 %v716_v42, %v545_v38 }
 0x3ce   :  { %v722_v45 = vsel %vm591_vm4, %v718_v44, -inf }
 0x3cf   :  { %723 = vmax.xlane.f32.xlu2 %v722_v45 }
 0x3e0   :  { %637 = vrot.lane.b32.xlu0 %v2706_v20, %s2419_s28 }
 0x42a   :  { %v721_v46 = vpop.xlane.xlu1 %720 }
 0x42b   :  { %v725_v47 = vsub.f32 %v717_v31, %v721_v46 }
 0x42d   :  { %v727_v48 = vmul.f32 1.442695, %v725_v47 }
 0x42f   :  { %1773 = vpow2.f32 %v727_v48 }
 0x435   :  { %v2737_v49 = vpop.eup %1773 }
 0x436   :  { %v731_v50 = vsel %vm587_vm3, %v2737_v49, 0.0 }
 0x437   :  { %v590_v51 = vpop.xlane.xlu2 %589  ;;  %732 = vadd.xlane.f32.xlu1 %v731_v50 }
 0x438   :  { %v595_v52 = vsub.f32 %v585_v35, %v590_v51 }
 0x43a   :  { %v597_v53 = vmul.f32 1.442695, %v595_v52 }
 0x43c   :  { %1775 = vpow2.f32 %v597_v53 }
 0x43f   :  { %v594_v54 = vpop.xlane.xlu0 %593 }
 0x440   :  { %v596_v55 = vsub.f32 %v586_v41, %v594_v54 }
 0x442   :  { %v1776_v56 = vpop.eup %1775  ;;  %v599_v57 = vmul.f32 1.442695, %v596_v55  ;;  %v724_v58 = vpop.xlane.xlu2 %723 }
 0x443   :  { %v726_v59 = vsub.f32 %v718_v44, %v724_v58  ;;  %v601_v60 = vsel %vm587_vm3, %v1776_v56, 0.0 }
 0x444   :  { %1777 = vpow2.f32 %v599_v57  ;;  %602 = vadd.xlane.f32.xlu2 %v601_v60  ;;  %v674_v60 = vld [vmem:[%s2960_s29] sm:$0xff] }
 0x445   :  { %v729_v61 = vmul.f32 1.442695, %v726_v59 }
 0x447   :  { %1779 = vpow2.f32 %v729_v61  ;;  %v804_v61 = vld [vmem:[%s2960_s29 + $0x18] sm:$0xff] }
 0x448   :  { %825 = vmatpush.msra.mxu1 %v804_v61 }
 0x44a   :  { %v1778_v62 = vpop.eup %1777 }
 0x44b   :  { %v604_v63 = vsel %vm591_vm4, %v1778_v62, 0.0 }
 0x44c   :  { %605 = vadd.xlane.f32.xlu0 %v604_v63 }
 0x44d   :  { %v2743_v0 = vpop.eup %1779 }
 0x44e   :  { %v734_v2 = vsel %vm591_vm4, %v2743_v0, 0.0 }
 0x44f   :  { %735 = vadd.xlane.f32.xlu1 %v734_v2  ;;  %v1752_v2 = vld [vmem:[#allocation15] ss:$0 sm:$0xff] }
 0x452   :  { %v638_v3 = vpop.permute.xlu0 %637 }
 0x45c   :  { %639 = vrot.lane.b32.xlu2 %v2710_v21, %s2419_s28 }
 0x460   :  { %767 = vrot.lane.b32.xlu0 %v2706_v20, %s2420_s27 }
 0x468   :  { %769 = vrot.lane.b32.xlu1 %v2710_v21, %s2420_s27 }
 0x4aa   :  { %v733_v5 = vpop.xlane.xlu1 %732 }
 0x4ab   :  { %v748_v43 = vand.u32 2147483648, %v733_v5  ;;  %vm742_vm15 = vweird.f32 %v733_v5  ;;  %v746_v44 = vand.u32 2147483647, %v733_v5 }
 0x4ad   :  { %v749_v47 = vor.u32 1.1754944e-38, %v748_v43 }
 0x4b7   :  { %v603_v4 = vpop.xlane.xlu2 %602 }
 0x4b8   :  { %1781 = vrcp.f32 %v603_v4  ;;  %v618_v11 = vand.u32 2147483648, %v603_v4  ;;  %v616_v15 = vand.u32 2147483647, %v603_v4  ;;  %vm612_vm7 = vweird.f32 %v603_v4 }
 0x4b9   :  { %1783 = vrcp.f32 %v733_v5 }
 0x4ba   :  { %v619_v22 = vor.u32 1.1754944e-38, %v618_v11  ;;  %vm617_vm9 = vcmp.eq.f32.partialorder %v616_v15, 8.507059e+37 }
 0x4be   :  { %v1782_v6 = vpop.eup %1781 }
 0x4bf   :  { %v608_v7 = vmul.f32 %v1782_v6, %v603_v4  ;;  %v606_v8 = vpop.xlane.xlu0 %605  ;;  %v640_v9 = vpop.permute.xlu2 %639  ;;  %vm613_vm6 = vweird.f32 %v1782_v6 }
 0x4c0   :  { %1785 = vrcp.f32 %v606_v8  ;;  %1652 = vmatpush.msk.msrb.mxu2 %vm648_vm5, %v640_v9  ;;  %v1784_v13 = vpop.eup %1783  ;;  %vm614_vm8 = vmor %vm612_vm7, %vm613_vm6  ;;  %v633_v30 = vand.u32 2147483648, %v606_v8  ;;  %v631_v33 = vand.u32 2147483647, %v606_v8  ;;  %vm627_vm11 = vweird.f32 %v606_v8 }
 0x4c1   :  { %v609_v10 = vsub.f32 1.0, %v608_v7  ;;  %v738_v21 = vmul.f32 %v1784_v13, %v733_v5  ;;  %vm743_vm14 = vweird.f32 %v1784_v13  ;;  %vm747_vm6 = vcmp.eq.f32.partialorder %v746_v44, 8.507059e+37 }
 0x4c2   :  { %666 = vmatpush.msrb.mxu2 %v638_v3  ;;  %v2751_v12 = vpop.xlane.xlu1 %735  ;;  %v634_v36 = vor.u32 1.1754944e-38, %v633_v30  ;;  %vm632_vm13 = vcmp.eq.f32.partialorder %v631_v33, 8.507059e+37  ;;  %vm744_vm4 = vmor %vm742_vm15, %vm743_vm14  ;;  %v425_v3 = vadd.f32 %v1752_v2, %v2704_v19 }
 0x4c3   :  { %v610_v14 = vmul.f32 %v1782_v6, %v609_v10  ;;  %1787 = vrcp.f32 %v2751_v12  ;;  %v739_v29 = vsub.f32 1.0, %v738_v21  ;;  %v763_v52 = vand.u32 2147483648, %v2751_v12 }
 0x4c4   :  { %854 = vmatpush.msra.mxu2 %v675_v23  ;;  %v761_v55 = vand.u32 2147483647, %v2751_v12  ;;  %1789 = vtanh.f32 %v425_v3 }
 0x4c5   :  { %v611_v16 = vadd.f32 %v1782_v6, %v610_v14  ;;  %v740_v35 = vmul.f32 %v1784_v13, %v739_v29  ;;  %v764_v57 = vor.u32 1.1754944e-38, %v763_v52 }
 0x4c6   :  { %v1786_v20 = vpop.eup %1785  ;;  %855 = vmatpush.msra.mxu2 %v674_v60 }
 0x4c7   :  { %v623_v24 = vmul.f32 %v1786_v20, %v606_v8  ;;  %v615_v25 = vsel %vm614_vm8, %v1782_v6, %v611_v16  ;;  %vm628_vm10 = vweird.f32 %v1786_v20  ;;  %v741_v41 = vadd.f32 %v1784_v13, %v740_v35  ;;  %v928_v35 = vld [vmem:[%s2962_s13] sm:$0xff] }
 0x4c8   :  { %v620_v26 = vsel %vm617_vm9, %v619_v22, %v615_v25  ;;  %vm629_vm12 = vmor %vm627_vm11, %vm628_vm10  ;;  %vm757_vm8 = vweird.f32 %v2751_v12  ;;  %vm762_vm10 = vcmp.eq.f32.partialorder %v761_v55, 8.507059e+37  ;;  %v2421_v16 = vmov 16.0  }
 0x4c9   :  { %v624_v27 = vsub.f32 1.0, %v623_v24  ;;  %v621_v28 = vmul.f32 %v1776_v56, %v620_v26  ;;  %v1788_v31 = vpop.eup %1787  ;;  %v745_v45 = vsel %vm744_vm4, %v1784_v13, %v741_v41  ;;  %1791 = vrcp.f32 %v2421_v16 }
 0x4ca   :  { %v753_v37 = vmul.f32 %v1788_v31, %v2751_v12  ;;  %v750_v48 = vsel %vm747_vm6, %v749_v47, %v745_v45  ;;  %vm758_vm7 = vweird.f32 %v1788_v31  ;;  %v2774_v5 = vpop.eup %1789  ;;  %v968_v45 = vld [vmem:[%s2963_s26 + $0x18] sm:$0xff]  ;;  %vm973_vm6 = vcmask 261120  }
 0x4cb   :  { %v625_v32 = vmul.f32 %v1786_v20, %v624_v27  ;;  %1653 = vmatmul.msk.f32.vlgmr.msrb.gmra.mxu2 %vm587_vm3, %v621_v28  ;;  %v751_v54 = vmul.f32 %v2737_v49, %v750_v48  ;;  %vm759_vm9 = vmor %vm757_vm8, %vm758_vm7  ;;  %v803_v49 = vld [vmem:[%s2960_s29 + $0x10] sm:$0xff] }
 0x4cc   :  { %v754_v42 = vsub.f32 1.0, %v753_v37  ;;  %826 = vmatpush.msra.mxu1 %v803_v49 }
 0x4cd   :  { %v626_v34 = vadd.f32 %v1786_v20, %v625_v32 }
 0x4ce   :  { %v755_v46 = vmul.f32 %v1788_v31, %v754_v42 }
 0x4cf   :  { %v630_v38 = vsel %vm629_vm12, %v1786_v20, %v626_v34  ;;  %v1792_v20 = vpop.eup %1791  ;;  %v929_v34 = vld [vmem:[%s2962_s13 + $0x8] sm:$0xff] }
 0x4d0   :  { %v635_v39 = vsel %vm632_vm13, %v634_v36, %v630_v38  ;;  %v756_v51 = vadd.f32 %v1788_v31, %v755_v46  ;;  %v874_v21 = vmul.f32 16.0, %v1792_v20  ;;  %954 = vmatpush.msra.mxu3 %v929_v34 }
 0x4d1   :  { %v636_v40 = vmul.f32 %v1778_v62, %v635_v39  ;;  %v1066_v62 = vld [vmem:[%s2961_s12 + $0x8] sm:$0xff]  ;;  %v1065_v39 = vld [vmem:[%s2961_s12] sm:$0xff] }
 0x4d2   :  { %v768_v53 = vpop.permute.xlu0 %767  ;;  %v760_v56 = vsel %vm759_vm9, %v1788_v31, %v756_v51  ;;  %1085 = vmatpush.msrb.mxu2 %v1066_v62  ;;  %v875_v22 = vsub.f32 1.0, %v874_v21  ;;  %955 = vmatpush.msra.mxu3 %v928_v35  ;;  %vm1535_vm9 = vcmask 126016  }
 0x4d3   :  { %1654 = vmatmul.msk.f32.gmra.mxu2 %vm587_vm3, %v636_v40  ;;  %v765_v58 = vsel %vm762_vm10, %v764_v57, %v760_v56  ;;  %v1754_v57 = vld [vmem:[#allocation18] ss:$0 sm:$0xff] }
 0x4d4   :  { %v766_v59 = vmul.f32 %v2743_v0, %v765_v58  ;;  %v876_v23 = vmul.f32 %v1792_v20, %v875_v22  ;;  %1105 = vmatpush.msrb.mxu3 %v1065_v39 }
 0x4d6   :  { %v877_v24 = vadd.f32 %v1792_v20, %v876_v23 }
 0x4da   :  { %v770_v50 = vpop.permute.xlu1 %769 }
 0x4db   :  { %1659 = vmatpush.msk.msra.mxu0 %vm648_vm5, %v770_v50 }
 0x4dd   :  { %795 = vmatpush.msra.mxu0 %v768_v53  ;;  %v1753_v53 = vld [vmem:[#allocation17] ss:$0 sm:$0xff] }
 0x4de   :  { %1660 = vmatmul.msk.f32.vlgmr.msra.gmra.mxu0 %vm587_vm3, %v751_v54 }
 0x4df   :  { %992 = vmatpush.msrb.mxu0 %v968_v45 }
 0x4e6   :  { %1661 = vmatmul.msk.f32.gmra.mxu0 %vm587_vm3, %v766_v59  ;;  %vm878_vm3 = vweird.f32 %v1792_v20 }
 0x54e   :  { %v668_v63 = vpop.f32.mrf.mxu2 }
 0x54f   :  { %1664 = vmatmul.msk.f32.vlgmr.msra.gmra.mxu2 %vm514_vm2, %v668_v63 }
 0x556   :  { %v671_v4 = vpop.f32.mrf.mxu2 }
 0x557   :  { %1665 = vmatmul.msk.f32.gmra.mxu2 %vm514_vm2, %v671_v4  ;;  %v967_v4 = vld [vmem:[%s2963_s26 + $0x10] sm:$0xff] }
 0x558   :  { %993 = vmatpush.msrb.mxu0 %v967_v4 }
 0x55b   :  { %v797_v0 = vpop.f32.mrf.mxu0 }
 0x55c   :  { %1662 = vmatmul.msk.f32.vlgmr.msra.gmra.mxu1 %vm514_vm2, %v797_v0  ;;  %v966_v0 = vld [vmem:[%s2963_s26 + $0x8] sm:$0xff] }
 0x55d   :  { %994 = vmatpush.msrb.mxu0 %v966_v0 }
 0x55f   :  { %1671 = vmatmul.msk.f32.vlgmr.msrb.gmra.mxu2 %vm403_vm0, %v2774_v5 }
 0x563   :  { %v800_v6 = vpop.f32.mrf.mxu0 }
 0x564   :  { %1663 = vmatmul.msk.f32.gmra.mxu1 %vm514_vm2, %v800_v6  ;;  %v965_v6 = vld [vmem:[%s2963_s26] sm:$0xff] }
 0x565   :  { %995 = vmatpush.msrb.mxu0 %v965_v6  ;;  %v1762_v6 = vld [vmem:[#allocation29] ss:$0 sm:$0xff] }
 0x5d2   :  { %v857_v7 = vpop.f32.mrf.mxu2 }
 0x5d9   :  { %v828_v8 = vpop.f32.mrf.mxu1 }
 0x5da   :  { %v858_v9 = vadd.f32 %v857_v7, %v828_v8  ;;  %v860_v11 = vpop.f32.mrf.mxu2  ;;  %v1233_v7 = vld [vmem:[%s2964_s1 + $0x8] sm:$0xff]  ;;  %v1755_v8 = vld [vmem:[#allocation20] ss:$0 sm:$0xff] }
 0x5db   :  { %1249 = vmatpush.msra.mxu0 %v1233_v7 }
 0x5dc   :  { %v863_v19 = vadd.f32 %v858_v9, %v2695_v17  ;;  %v2783_v17 = vsel %vm878_vm3, %v1792_v20, %v877_v24 }
 0x5de   :  { %v867_v10 = vsel %vm514_vm2, %v863_v19, 0.0 }
 0x5df   :  { %868 = vadd.xlane.f32.xlu2 %v867_v10 }
 0x5e1   :  { %v831_v12 = vpop.f32.mrf.mxu1 }
 0x5e2   :  { %v861_v13 = vadd.f32 %v860_v11, %v831_v12 }
 0x5e4   :  { %v864_v14 = vadd.f32 %v861_v13, %v2700_v18 }
 0x5e6   :  { %v870_v15 = vsel %vm454_vm1, %v864_v14, 0.0 }
 0x5e7   :  { %871 = vadd.xlane.f32.xlu0 %v870_v15  ;;  %v1756_v15 = vld [vmem:[#allocation21] ss:$0 sm:$0xff] }
 0x652   :  { %v869_v25 = vpop.xlane.xlu2 %868 }
 0x653   :  { %v880_v26 = vmul.f32 %v2783_v17, %v869_v25 }
 0x655   :  { %v882_v27 = vsub.f32 %v863_v19, %v880_v26 }
 0x657   :  { %v884_v18 = vmul.f32 %v882_v27, %v882_v27 }
 0x659   :  { %v886_v28 = vsel %vm514_vm2, %v884_v18, 0.0  ;;  %v1036_v18 = vld [vmem:[%s2965_s2 + $0x8] sm:$0xff] }
 0x65a   :  { %887 = vadd.xlane.f32.xlu1 %v886_v28  ;;  %v872_v29 = vpop.xlane.xlu0 %871  ;;  %v1035_v28 = vld [vmem:[%s2965_s2] sm:$0xff]  ;;  %1058 = vmatpush.msrb.mxu1 %v1036_v18 }
 0x65b   :  { %v881_v30 = vmul.f32 %v2783_v17, %v872_v29 }
 0x65c   :  { %1059 = vmatpush.msrb.mxu1 %v1035_v28  ;;  %v2851_v28 = vld [vmem:[#allocation6] sm:$0xf] }
 0x65d   :  { %v883_v31 = vsub.f32 %v864_v14, %v881_v30 }
 0x65f   :  { %v885_v32 = vmul.f32 %v883_v31, %v883_v31 }
 0x661   :  { %v889_v33 = vsel %vm454_vm1, %v885_v32, 0.0 }
 0x662   :  { %890 = vadd.xlane.f32.xlu2 %v889_v33 }
 0x6cd   :  { %v888_v36 = vpop.xlane.xlu1 %887 }
 0x6ce   :  { %v892_v37 = vmul.f32 %v888_v36, %v2783_v17 }
 0x6d0   :  { %v894_v38 = vadd.f32 1e-06, %v892_v37  ;;  %v1757_v37 = vld [vmem:[#allocation23] ss:$0 sm:$0xff] }
 0x6d2   :  { %1793 = vrsqrt.f32 %v894_v38  ;;  %vm902_vm12 = vweird.f32 %v894_v38 }
 0x6d5   :  { %v891_v40 = vpop.xlane.xlu2 %890 }
 0x6d6   :  { %v893_v41 = vmul.f32 %v891_v40, %v2783_v17  ;;  %v1758_v40 = vld [vmem:[%s2966_s7] ss:$0 sm:$0xff] }
 0x6d8   :  { %v1794_v42 = vpop.eup %1793  ;;  %v895_v43 = vadd.f32 1e-06, %v893_v41 }
 0x6d9   :  { %v897_v44 = vmul.f32 %v1794_v42, %v894_v38  ;;  %vm903_vm11 = vweird.f32 %v1794_v42 }
 0x6da   :  { %1795 = vrsqrt.f32 %v895_v43  ;;  %vm904_vm13 = vmor %vm902_vm12, %vm903_vm11  ;;  %vm912_vm15 = vweird.f32 %v895_v43 }
 0x6db   :  { %v898_v46 = vmul.f32 %v1794_v42, %v897_v44 }
 0x6dd   :  { %v899_v47 = vmul.f32 0.5, %v898_v46 }
 0x6df   :  { %v900_v48 = vsub.f32 1.5, %v899_v47  ;;  %v1144_v47 = vld [vmem:[%s2967_s19 + $0x18] sm:$0xff] }
 0x6e0   :  { %v1796_v50 = vpop.eup %1795  ;;  %1164 = vmatpush.msra.mxu2 %v1144_v47  ;;  %v1336_v47 = vld [vmem:[%s2970_s9] sm:$0xff] }
 0x6e1   :  { %v901_v51 = vmul.f32 %v1794_v42, %v900_v48  ;;  %v907_v52 = vmul.f32 %v1796_v50, %v895_v43  ;;  %vm913_vm14 = vweird.f32 %v1796_v50  ;;  %v1759_v43 = vld [vmem:[#allocation24] ss:$0 sm:$0xff]  ;;  %v1143_v48 = vld [vmem:[%s2967_s19 + $0x10] sm:$0xff] }
 0x6e2   :  { %vm914_vm4 = vmor %vm912_vm15, %vm913_vm14  ;;  %1165 = vmatpush.msra.mxu2 %v1143_v48  ;;  %v1764_v48 = vld [vmem:[%s2971_s10] ss:$0 sm:$0xff] }
 0x6e3   :  { %v905_v54 = vsel %vm904_vm13, %v1794_v42, %v901_v51  ;;  %v908_v55 = vmul.f32 %v1796_v50, %v907_v52  ;;  %v1110_v42 = vld [vmem:[%s2961_s12 + $0x10] sm:$0xff]  ;;  %v1141_v51 = vld [vmem:[%s2967_s19] sm:$0xff] }
 0x6e4   :  { %v916_v56 = vmul.f32 %v905_v54, %v882_v27  ;;  %1129 = vmatpush.msra.mxu1 %v1110_v42  ;;  %v1277_v52 = vld [vmem:[%s2964_s1 + $0x10] sm:$0xff]  ;;  %v1087_v54 = vpop.f32.mrf.mxu2 }
 0x6e5   :  { %v909_v58 = vmul.f32 0.5, %v908_v55 }
 0x6e6   :  { %v921_v59 = vmul.f32 %v1753_v53, %v916_v56  ;;  %v1760_v56 = vld [vmem:[#allocation26] ss:$0 sm:$0xff] }
 0x6e7   :  { %v910_v60 = vsub.f32 1.5, %v909_v58 }
 0x6e8   :  { %v926_v61 = vadd.f32 %v1754_v57, %v921_v59 }
 0x6e9   :  { %v911_v49 = vmul.f32 %v1796_v50, %v910_v60 }
 0x6ea   :  { %1666 = vmatmul.msk.f32.vlgmr.msra.gmra.mxu3 %vm514_vm2, %v926_v61  ;;  %v1176_v61 = vld [vmem:[%s2968_s25 + $0x18] sm:$0xff] }
 0x6eb   :  { %v915_v62 = vsel %vm914_vm4, %v1796_v50, %v911_v49  ;;  %v1142_v50 = vld [vmem:[%s2967_s19 + $0x8] sm:$0xff]  ;;  %v1175_v49 = vld [vmem:[%s2968_s25 + $0x10] sm:$0xff]  ;;  %1196 = vmatpush.msra.mxu3 %v1176_v61 }
 0x6ec   :  { %v917_v63 = vmul.f32 %v915_v62, %v883_v31  ;;  %1166 = vmatpush.msra.mxu2 %v1142_v50  ;;  %v1174_v62 = vld [vmem:[%s2968_s25 + $0x8] sm:$0xff] }
 0x6ed   :  { %1197 = vmatpush.msra.mxu3 %v1175_v49 }
 0x6ee   :  { %v922_v2 = vmul.f32 %v1753_v53, %v917_v63  ;;  %1167 = vmatpush.msra.mxu2 %v1141_v51  ;;  %v1173_v63 = vld [vmem:[%s2968_s25] sm:$0xff] }
 0x6ef   :  { %1198 = vmatpush.msra.mxu3 %v1174_v62 }
 0x6f0   :  { %v927_v3 = vadd.f32 %v1754_v57, %v922_v2  ;;  %1293 = vmatpush.msrb.mxu2 %v1277_v52  ;;  %v1761_v2 = vld [vmem:[#allocation27] ss:$0 sm:$0xff] }
 0x6f1   :  { %1199 = vmatpush.msra.mxu3 %v1173_v63 }
 0x6f2   :  { %1667 = vmatmul.msk.f32.gmra.mxu3 %vm514_vm2, %v927_v3 }
 0x6fa   :  { %1672 = vmatmul.msk.f32.vlgmr.msrb.gmra.mxu3 %vm403_vm0, %v2681_v1 }
 0x76d   :  { %v957_v9 = vpop.f32.mrf.mxu3 }
 0x76e   :  { %v958_v19 = vadd.f32 %v1755_v8, %v957_v9 }
 0x770   :  { %v963_v10 = vmax.f32 %v958_v19, 0.0 }
 0x772   :  { %1668 = vmatmul.msk.f32.vlgmr.msrb.gmra.mxu0 %vm973_vm6, %v963_v10 }
 0x775   :  { %v960_v11 = vpop.f32.mrf.mxu3 }
 0x776   :  { %v961_v12 = vadd.f32 %v1755_v8, %v960_v11 }
 0x778   :  { %v964_v13 = vmax.f32 %v961_v12, 0.0 }
 0x77a   :  { %1669 = vmatmul.msk.f32.gmra.mxu0 %vm973_vm6, %v964_v13 }
 0x77d   :  { %v1107_v53 = vpop.f32.mrf.mxu3 }
 0x77e   :  { %v1108_v55 = vadd.f32 %v1107_v53, %v1087_v54  ;;  %v1368_v53 = vld [vmem:[%s2972_s15] sm:$0xff] }
 0x77f   :  { %v1765_v54 = vld [vmem:[%s2973_s3] ss:$0 sm:$0xff] }
 0x782   :  { %1676 = vmatmul.msk.f32.vlgmr.msra.gmra.mxu0 %vm403_vm0, %v2774_v5 }
 0x7ef   :  { %v997_v14 = vpop.f32.mrf.mxu0 }
 0x7f7   :  { %v999_v16 = vpop.f32.mrf.mxu0 }
 0x7f8   :  { %v1000_v20 = vadd.f32 %v1756_v15, %v999_v16 }
 0x7fa   :  { %v1002_v21 = vadd.f32 %v1000_v20, %v927_v3 }
 0x7fc   :  { %v1005_v22 = vsel %vm454_vm1, %v1002_v21, 0.0 }
 0x7fd   :  { %1006 = vadd.xlane.f32.xlu0 %v1005_v22 }
 0x870   :  { %v1007_v23 = vpop.xlane.xlu0 %1006 }
 0x871   :  { %v1008_v24 = vmul.f32 %v1007_v23, %v2783_v17 }
 0x873   :  { %v1009_v25 = vsub.f32 %v1002_v21, %v1008_v24 }
 0x875   :  { %v1010_v26 = vmul.f32 %v1009_v25, %v1009_v25 }
 0x877   :  { %v1011_v27 = vsel %vm454_vm1, %v1010_v26, 0.0 }
 0x878   :  { %1012 = vadd.xlane.f32.xlu2 %v1011_v27 }
 0x8eb   :  { %v1013_v5 = vpop.xlane.xlu2 %1012 }
 0x8ec   :  { %v1014_v29 = vmul.f32 %v1013_v5, %v2783_v17 }
 0x8ee   :  { %v1015_v30 = vadd.f32 1e-06, %v1014_v29  ;;  %v1232_v29 = vld [vmem:[%s2964_s1] sm:$0xff] }
 0x8f0   :  { %1797 = vrsqrt.f32 %v1015_v30  ;;  %vm1022_vm1 = vweird.f32 %v1015_v30 }
 0x8f6   :  { %v1798_v31 = vpop.eup %1797 }
 0x8f7   :  { %v1017_v32 = vmul.f32 %v1798_v31, %v1015_v30  ;;  %vm1023_vm7 = vweird.f32 %v1798_v31  ;;  %v1212_v30 = vld [vmem:[#allocation8] sm:$0xf] }
 0x8f8   :  { %vm1024_vm8 = vmor %vm1022_vm1, %vm1023_vm7 }
 0x8f9   :  { %v1018_v33 = vmul.f32 %v1798_v31, %v1017_v32 }
 0x8fb   :  { %v1019_v34 = vmul.f32 0.5, %v1018_v33 }
 0x8fd   :  { %v1020_v35 = vsub.f32 1.5, %v1019_v34  ;;  %v1307_v34 = vld [vmem:[%s2969_s0 + $0x18] sm:$0xff] }
 0x8fe   :  { %1327 = vmatpush.msrb.mxu3 %v1307_v34 }
 0x8ff   :  { %v1021_v36 = vmul.f32 %v1798_v31, %v1020_v35  ;;  %v1306_v35 = vld [vmem:[%s2969_s0 + $0x10] sm:$0xff] }
 0x900   :  { %1328 = vmatpush.msrb.mxu3 %v1306_v35  ;;  %v2424_v35 = vmov 8.0  }
 0x901   :  { %v1025_v38 = vsel %vm1024_vm8, %v1798_v31, %v1021_v36  ;;  %v1305_v36 = vld [vmem:[%s2969_s0 + $0x8] sm:$0xff] }
 0x902   :  { %v1026_v39 = vmul.f32 %v1025_v38, %v1009_v25  ;;  %1329 = vmatpush.msrb.mxu3 %v1305_v36  ;;  %v1251_v38 = vpop.f32.mrf.mxu0 }
 0x904   :  { %v1030_v17 = vmul.f32 %v1757_v37, %v1026_v39  ;;  %v1304_v37 = vld [vmem:[%s2969_s0] sm:$0xff] }
 0x905   :  { %1330 = vmatpush.msrb.mxu3 %v1304_v37 }
 0x906   :  { %v1034_v41 = vadd.f32 %v1758_v40, %v1030_v17  ;;  %v1763_v17 = vld [vmem:[#allocation30] ss:$0 sm:$0xff] }
 0x908   :  { %1670 = vmatmul.msk.f32.vlgmr.msrb.gmra.mxu1 %vm514_vm2, %v1034_v41  ;;  %vm1458_vm2 = vcmask 60416  }
 0x909   :  { %v1486_v5 = vsel %vm1458_vm2, %v2851_v28, 0.0  ;;  %1272 = vmatpush.msrb.mxu1 %v1232_v29 }
 0x985   :  { %v1061_v44 = vpop.f32.mrf.mxu1 }
 0x986   :  { %v1062_v45 = vadd.f32 %v1759_v43, %v1061_v44  ;;  %v1339_v44 = vld [vmem:[%s2970_s9 + $0x18] sm:$0xff] }
 0x987   :  { %1359 = vmatpush.msrb.mxu0 %v1339_v44 }
 0x988   :  { %1799 = vtanh.f32 %v1062_v45  ;;  %v1338_v45 = vld [vmem:[%s2970_s9 + $0x10] sm:$0xff] }
 0x989   :  { %1360 = vmatpush.msrb.mxu0 %v1338_v45 }
 0x98e   :  { %v1800_v46 = vpop.eup %1799 }
 0x98f   :  { %1673 = vmatmul.msk.f32.vlgmr.msra.gmra.mxu1 %vm403_vm0, %v1800_v46 }
 0x990   :  { %1391 = vmatpush.msra.mxu1 %v1368_v53 }
 0xa0c   :  { %v1131_v57 = vpop.f32.mrf.mxu1 }
 0xa0d   :  { %v1134_v58 = vadd.f32 %v1131_v57, %v1108_v55 }
 0xa0f   :  { %v1139_v59 = vadd.f32 %v1760_v56, %v1134_v58  ;;  %v1766_v58 = vld [vmem:[%s2608_s6] ss:$0 sm:$0xff]  ;;  %s2423_s6 = smov 8  }
 0xa11   :  { %1801 = vtanh.f32 %v1139_v59 }
 0xa17   :  { %v1802_v60 = vpop.eup %1801 }
 0xa18   :  { %1674 = vmatmul.msk.f32.vlgmr.msra.gmra.mxu2 %vm973_vm6, %v1802_v60 }
 0xa20   :  { %1678 = vmatmul.msk.f32.vlgmr.msrb.gmra.mxu2 %vm403_vm0, %v1800_v46  ;;  %v1337_v46 = vld [vmem:[%s2970_s9 + $0x8] sm:$0xff] }
 0xa21   :  { %1361 = vmatpush.msrb.mxu0 %v1337_v46 }
 0xa23   :  { %1362 = vmatpush.msrb.mxu0 %v1336_v47 }
 0xa9b   :  { %v1169_v3 = vpop.f32.mrf.mxu2 }
 0xa9c   :  { %v1170_v4 = vadd.f32 %v1761_v2, %v1169_v3 }
 0xa9e   :  { %1803 = vtanh.f32 %v1170_v4 }
 0xaa3   :  { %v1295_v41 = vpop.f32.mrf.mxu2 }
 0xaa4   :  { %v1804_v0 = vpop.eup %1803 }
 0xaa5   :  { %1675 = vmatmul.msk.f32.vlgmr.msra.gmra.mxu3 %vm973_vm6, %v1804_v0 }
 0xb28   :  { %v1201_v7 = vpop.f32.mrf.mxu3 }
 0xb29   :  { %v2829_v8 = vadd.f32 %v1762_v6, %v1201_v7 }
 0xb2b   :  { %v1205_v9 = vmin.f32 %v2829_v8, 20.0  ;;  %1543 = vst.msk [vmem:[#allocation33] sm:$0xf] %vm1458_vm2, %v2829_v8  ;;  %vm1204_vm10 = vcmp.gt.f32.partialorder %v2829_v8, 20.0 }
 0xb2d   :  { %v1206_v19 = vmul.f32 1.442695, %v1205_v9 }
 0xb2f   :  { %1805 = vpow2.f32 %v1206_v19 }
 0xb35   :  { %v1806_v10 = vpop.eup %1805 }
 0xb36   :  { %v1208_v11 = vadd.f32 1.0, %v1806_v10 }
 0xb38   :  { %1807 = vlog2.f32 %v1208_v11 }
 0xb3e   :  { %v1808_v12 = vpop.eup %1807 }
 0xb3f   :  { %v1210_v13 = vmul.f32 0.6931472, %v1808_v12 }
 0xb41   :  { %v2836_v14 = vsel %vm1204_vm10, %v2829_v8, %v1210_v13 }
 0xb42   :  { %v2839_v15 = vadd.f32 1e-07, %v2836_v14  ;;  %1544 = vst.msk [vmem:[#allocation33] sm:$0xf] %vm1535_vm9, %v2836_v14 }
 0xb44   :  { %1809 = vrsqrt.f32 %v2839_v15  ;;  %vm1221_vm3 = vcmp.eq.f32.partialorder %v2839_v15, inf  ;;  %v1224_v26 = vand.u32 2147483648, %v2839_v15  ;;  %vm1223_vm11 = vcmp.eq.f32.partialorder %v2839_v15, 0.0 }
 0xb4a   :  { %v1810_v16 = vpop.eup %1809 }
 0xb4b   :  { %v1215_v20 = vmul.f32 %v1810_v16, %v2839_v15 }
 0xb4d   :  { %v1216_v21 = vmul.f32 %v1810_v16, %v1215_v20 }
 0xb4f   :  { %v1217_v22 = vmul.f32 0.5, %v1216_v21 }
 0xb51   :  { %v1218_v23 = vsub.f32 1.5, %v1217_v22 }
 0xb53   :  { %v1219_v24 = vmul.f32 %v1810_v16, %v1218_v23 }
 0xb55   :  { %v1220_v25 = vmul.f32 %v1219_v24, %v2839_v15 }
 0xb57   :  { %v1222_v27 = vsel %vm1221_vm3, %v2839_v15, %v1220_v25 }
 0xb58   :  { %v1225_v18 = vsel %vm1223_vm11, %v1224_v26, %v1222_v27 }
 0xb59   :  { %1227 = vrot.lane.b32.xlu1 %v1225_v18, %s2422_s8 }
 0xb83   :  { %1487 = vadd.xlane.f32.xlu1 %v1486_v5 }
 0xbcb   :  { %v1228_v31 = vpop.permute.xlu1 %1227 }
 0xbcc   :  { %v1230_v32 = vmul.f32 %v1228_v31, %v1212_v30 }
 0xbce   :  { %v2857_v33 = vadd.f32 %v1230_v32, %v2829_v8 }
 0xbd0   :  { %1677 = vmatmul.msk.f32.vlgmr.msrb.gmra.mxu1 %vm403_vm0, %v2857_v33 }
 0xc4d   :  { %v1274_v39 = vpop.f32.mrf.mxu1 }
 0xc4e   :  { %v1275_v40 = vadd.f32 %v1274_v39, %v1251_v38 }
 0xc50   :  { %v1298_v42 = vadd.f32 %v1295_v41, %v1275_v40 }
 0xc52   :  { %v1303_v43 = vadd.f32 %v1763_v17, %v1298_v42 }
 0xc54   :  { %1679 = vmatmul.msk.f32.vlgmr.msrb.gmra.mxu3 %vm973_vm6, %v1303_v43 }
 0xcd7   :  { %v1332_v50 = vpop.f32.mrf.mxu3 }
 0xcd8   :  { %v1333_v51 = vadd.f32 %v1764_v48, %v1332_v50  ;;  %v1488_v48 = vpop.xlane.xlu1 %1487 }
 0xcda   :  { %1811 = vtanh.f32 %v1333_v51 }
 0xce0   :  { %v1812_v52 = vpop.eup %1811 }
 0xce1   :  { %1680 = vmatmul.msk.f32.vlgmr.msrb.gmra.mxu0 %vm973_vm6, %v1812_v52 }
 0xd5e   :  { %v1364_v55 = vpop.f32.mrf.mxu0 }
 0xd5f   :  { %v1365_v56 = vadd.f32 %v1765_v54, %v1364_v55  ;;  %v1499_v55 = vsub.f32 %v2857_v33, %v2829_v8 }
 0xd61   :  { %1813 = vtanh.f32 %v1365_v56 }
 0xd67   :  { %v1814_v57 = vpop.eup %1813 }
 0xd68   :  { %1681 = vmatmul.msk.f32.vlgmr.msra.gmra.mxu1 %vm403_vm0, %v1814_v57 }
 0xde5   :  { %v1393_v59 = vpop.f32.mrf.mxu1 }
 0xde6   :  { %v2876_v60 = vadd.f32 %v1766_v58, %v1393_v59  ;;  %v1490_v58 = vmul.f32 %v2857_v33, %v2857_v33 }
 0xde8   :  { %1534 = vst.msk [vmem:[#allocation32] sm:$0xf] %vm1458_vm2, %v2876_v60  ;;  %v1397_v61 = vmin.f32 %v2876_v60, 20.0  ;;  %vm1396_vm12 = vcmp.gt.f32.partialorder %v2876_v60, 20.0  ;;  %v1427_v13 = vsub.f32 %v2681_v1, %v2876_v60 }
 0xdea   :  { %v1398_v49 = vmul.f32 1.442695, %v1397_v61  ;;  %v1428_v23 = vmul.f32 %v1427_v13, %v1427_v13 }
 0xdec   :  { %1815 = vpow2.f32 %v1398_v49  ;;  %v1500_v49 = vmul.f32 %v1499_v55, %v1499_v55 }
 0xdf2   :  { %v1816_v62 = vpop.eup %1815 }
 0xdf3   :  { %v1400_v63 = vadd.f32 1.0, %v1816_v62 }
 0xdf5   :  { %1817 = vlog2.f32 %v1400_v63 }
 0xdfb   :  { %v1818_v2 = vpop.eup %1817 }
 0xdfc   :  { %v1402_v3 = vmul.f32 0.6931472, %v1818_v2 }
 0xdfe   :  { %v1403_v4 = vsel %vm1396_vm12, %v2876_v60, %v1402_v3 }
 0xdff   :  { %1430 = vrot.lane.b32.xlu0 %v1403_v4, %s2422_s8  ;;  %1536 = vst.msk [vmem:[#allocation32] sm:$0xf] %vm1535_vm9, %v1403_v4  ;;  %v1405_v0 = vadd.f32 1e-07, %v1403_v4 }
 0xe01   :  { %1819 = vrsqrt.f32 %v1405_v0  ;;  %vm1413_vm4 = vcmp.eq.f32.partialorder %v1405_v0, inf  ;;  %v1416_v32 = vand.u32 2147483648, %v1405_v0  ;;  %vm1415_vm6 = vcmp.eq.f32.partialorder %v1405_v0, 0.0 }
 0xe07   :  { %1502 = vrot.lane.b32.xlu0 %v2836_v14, %s2422_s8  ;;  %v1820_v7 = vpop.eup %1819 }
 0xe08   :  { %v1407_v10 = vmul.f32 %v1820_v7, %v1405_v0 }
 0xe0a   :  { %v1408_v21 = vmul.f32 %v1820_v7, %v1407_v10 }
 0xe0c   :  { %v1409_v25 = vmul.f32 0.5, %v1408_v21 }
 0xe0e   :  { %v1410_v18 = vsub.f32 1.5, %v1409_v25 }
 0xe10   :  { %v1411_v5 = vmul.f32 %v1820_v7, %v1410_v18 }
 0xe12   :  { %v1412_v30 = vmul.f32 %v1411_v5, %v1405_v0 }
 0xe14   :  { %v1414_v31 = vsel %vm1413_vm4, %v1405_v0, %v1412_v30 }
 0xe15   :  { %v1417_v34 = vsel %vm1415_vm6, %v1416_v32, %v1414_v31 }
 0xe71   :  { %v1431_v6 = vpop.permute.xlu0 %1430 }
 0xe72   :  { %1821 = vrcp.f32 %v1431_v6  ;;  %v1444_v12 = vand.u32 2147483648, %v1431_v6  ;;  %v1442_v20 = vand.u32 2147483647, %v1431_v6  ;;  %vm1438_vm13 = vweird.f32 %v1431_v6 }
 0xe73   :  { %1823 = vlog2.f32 %v2839_v15 }
 0xe74   :  { %v1445_v14 = vor.u32 1.1754944e-38, %v1444_v12  ;;  %vm1443_vm15 = vcmp.eq.f32.partialorder %v1442_v20, 8.507059e+37  ;;  %1825 = vrcp.f32 %v2424_v35 }
 0xe78   :  { %v1822_v9 = vpop.eup %1821 }
 0xe79   :  { %v1434_v19 = vmul.f32 %v1822_v9, %v1431_v6  ;;  %vm1439_vm0 = vweird.f32 %v1822_v9  ;;  %v1824_v1 = vpop.eup %1823  ;;  %v1503_v15 = vpop.permute.xlu0 %1502 }
 0xe7a   :  { %vm1440_vm14 = vmor %vm1438_vm13, %vm1439_vm0  ;;  %v1493_v29 = vmul.f32 0.6931472, %v1824_v1  ;;  %1827 = vrcp.f32 %v1503_v15  ;;  %v1826_v36 = vpop.eup %1825  ;;  %v1516_v50 = vand.u32 2147483648, %v1503_v15  ;;  %vm1510_vm8 = vweird.f32 %v1503_v15 }
 0xe7b   :  { %v1435_v11 = vsub.f32 1.0, %v1434_v19  ;;  %v1463_v38 = vmul.f32 8.0, %v1826_v36  ;;  %1829 = vlog2.f32 %v1405_v0  ;;  %vm1467_vm7 = vweird.f32 %v1826_v36  ;;  %v1404_v0 = vld [vmem:[#allocation9] sm:$0xf] }
 0xe7c   :  { %v1514_v53 = vand.u32 2147483647, %v1503_v15  ;;  %v1517_v57 = vor.u32 1.1754944e-38, %v1516_v50 }
 0xe7d   :  { %v1436_v16 = vmul.f32 %v1822_v9, %v1435_v11  ;;  %v1464_v40 = vsub.f32 1.0, %v1463_v38 }
 0xe7e   :  { %vm1515_vm10 = vcmp.eq.f32.partialorder %v1514_v53, 8.507059e+37 }
 0xe7f   :  { %v1437_v22 = vadd.f32 %v1822_v9, %v1436_v16  ;;  %v1465_v41 = vmul.f32 %v1826_v36, %v1464_v40 }
 0xe80   :  { %v1828_v37 = vpop.eup %1827 }
 0xe81   :  { %v1441_v24 = vsel %vm1440_vm14, %v1822_v9, %v1437_v22  ;;  %v1506_v39 = vmul.f32 %v1828_v37, %v1503_v15  ;;  %v1830_v43 = vpop.eup %1829  ;;  %v1466_v44 = vadd.f32 %v1826_v36, %v1465_v41  ;;  %vm1511_vm1 = vweird.f32 %v1828_v37 }
 0xe82   :  { %v1446_v26 = vsel %vm1443_vm15, %v1445_v14, %v1441_v24  ;;  %v1426_v45 = vmul.f32 0.6931472, %v1830_v43  ;;  %vm1512_vm9 = vmor %vm1510_vm8, %vm1511_vm1 }
 0xe83   :  { %v1447_v27 = vmul.f32 %v1446_v26, %v1428_v23  ;;  %v1507_v17 = vsub.f32 1.0, %v1506_v39  ;;  %v2892_v47 = vsel %vm1467_vm7, %v1826_v36, %v1466_v44 }
 0xe84   :  { %v1489_v54 = vmul.f32 %v1488_v48, %v2892_v47 }
 0xe85   :  { %1449 = vrot.lane.b32.xlu2 %v1447_v27, %s2423_s6  ;;  %v1508_v42 = vmul.f32 %v1828_v37, %v1507_v17 }
 0xe86   :  { %v1491_v61 = vmul.f32 %v1490_v58, %v1489_v54 }
 0xe87   :  { %v1509_v46 = vadd.f32 %v1828_v37, %v1508_v42 }
 0xe89   :  { %v1513_v56 = vsel %vm1512_vm9, %v1828_v37, %v1509_v46 }
 0xe8a   :  { %v1518_v59 = vsel %vm1515_vm10, %v1517_v57, %v1513_v56 }
 0xe8b   :  { %v1519_v2 = vmul.f32 %v1518_v59, %v1500_v49 }
 0xe8d   :  { %1495 = vrot.lane.b32.xlu2 %v1493_v29, %s2422_s8 }
 0xe95   :  { %1419 = vrot.lane.b32.xlu2 %v1417_v34, %s2422_s8 }
 0xedf   :  { %v1450_v51 = vpop.permute.xlu2 %1449 }
 0xee0   :  { %v1452_v52 = vadd.f32 %v1450_v51, %v1426_v45 }
 0xee2   :  { %1454 = vrot.lane.b32.xlu0 %v1452_v52, %s2422_s8 }
 0xee7   :  { %v1496_v62 = vpop.permute.xlu2 %1495 }
 0xee8   :  { %v1498_v63 = vsub.f32 %v1491_v61, %v1496_v62 }
 0xeea   :  { %v1520_v3 = vsub.f32 %v1498_v63, %v1519_v2 }
 0xeec   :  { %v1521_v4 = vsel %vm1458_vm2, %v1520_v3, 0.0 }
 0xeed   :  { %1522 = vadd.xlane.f32.xlu2 %v1521_v4 }
 0xeef   :  { %v1420_v6 = vpop.permute.xlu2 %1419 }
 0xef0   :  { %v1422_v8 = vmul.f32 %v1420_v6, %v1404_v0 }
 0xef2   :  { %v1423_v7 = vadd.f32 %v1422_v8, %v2876_v60 }
 0xef4   :  { %1538 = vrot.lane.b32.xlu1 %v1423_v7, %s2425_s14 }
 0xf54   :  { %v1455_v33 = vpop.permute.xlu0 %1454 }
 0xf55   :  { %v1457_v9 = vmul.f32 %v1455_v33, %v2851_v28 }
 0xf57   :  { %v1459_v19 = vsel %vm1458_vm2, %v1457_v9, 0.0 }
 0xf58   :  { %1460 = vadd.xlane.f32.xlu0 %v1459_v19 }
 0xf59   :  { %2288 = shalt.err (!%p2285_p10)
}
 0xf5a   :  { %1569 = dma.vmem_to_hbm [thread:$0]  %s1565_s30, 64, %s1567_s16, [#allocation34]   ;;  %vm1541_vm2 = vcmask 191616  }
 0xf5b   :  { %s2427_s5 = smov [#allocation32]   ;;  %s1555_s23 = sshll.u32 %s2613_s20, 4  ;;  %s1556_s23 = int_to_ptr.hbm [resolvable:$true] %s1555_s23 }
 0xf5c   :  { %s1553_s22 = sshll.u32 %s2427_s5, 4  ;;  %s2301_s28 = sshra.s32 %s1556_s23, 4  ;;  %s1554_s22 = int_to_ptr.vmem [resolvable:$true] %s1553_s22  ;;  %s2302_s28 = int_to_ptr.hbm [resolvable:$true] %s2301_s28 }
 0xf5d   :  { %s2303_s27 = scalar_lea.hbm %s2302_s28, 4  ;;  %s2305_s4 = scalar_lea.hbm %s2613_s20, 4 }
 0xf5e   :  { %p2304_p11 = scmp.ne.s32.totalorder %s2302_s28, %s2303_s27  ;;  %p2306_p12 = scmp.lt.s32.totalorder %s2302_s28, %s2613_s20 }
 0xf5f   :  { %p2307_p13 = scmp.lt.s32.totalorder %s2305_s4, %s2303_s27 }
 0xf61   :  { %p2308_p0 = por %p2307_p13, %p2306_p12 }
 0xf63   :  { %p2309_p1 = pnand %p2308_p0, %p2304_p11 }
 0xf66   :  { %v1539_v28 = vpop.permute.xlu1 %1538 }
 0xf67   :  { %1542 = vst.msk [vmem:[#allocation32] sm:$0xf] %vm1541_vm2, %v1539_v28 }
 0xf68   :  { %2312 = shalt.err (!%p2309_p1)
}
 0xf69   :  { %1558 = dma.vmem_to_hbm [thread:$0]  %s1554_s22, 64, %s1556_s23, [#allocation5]   ;;  %v1523_v60 = vpop.xlane.xlu2 %1522  ;;  %v2428_v12 = vmov 4.0  }
 0xf6a   :  { %v1524_v10 = vmul.f32 %v1523_v60, %v2892_v47  ;;  %1831 = vrcp.f32 %v2428_v12  ;;  %s2429_s20 = smov [#allocation35]   ;;  %s1577_s12 = sshll.u32 %s2623_s21, 4  ;;  %s1578_s12 = int_to_ptr.hbm [resolvable:$true] %s1577_s12 }
 0xf6b   :  { %s1575_s29 = sshll.u32 %s2429_s20, 4  ;;  %s2325_s13 = sshra.s32 %s1578_s12, 4  ;;  %s1576_s29 = int_to_ptr.vmem [resolvable:$true] %s1575_s29  ;;  %s2326_s13 = int_to_ptr.hbm [resolvable:$true] %s2325_s13 }
 0xf6c   :  { %v1525_v11 = vmul.f32 0.5, %v1524_v10  ;;  %s2327_s26 = scalar_lea.hbm %s2326_s13, 1  ;;  %s2329_s1 = scalar_lea.hbm %s2623_s21, 1 }
 0xf6d   :  { %p2328_p2 = scmp.ne.s32.totalorder %s2326_s13, %s2327_s26  ;;  %p2330_p3 = scmp.lt.s32.totalorder %s2326_s13, %s2623_s21 }
 0xf6e   :  { %v1526_v13 = vsel %vm648_vm5, %v1525_v11, 0.0  ;;  %p2331_p4 = scmp.lt.s32.totalorder %s2329_s1, %s2327_s26 }
 0xf6f   :  { %v1527_v16 = vrot.slane %v1526_v13, 4 }
 0xf70   :  { %v1832_v20 = vpop.eup %1831  ;;  %p2332_p5 = por %p2331_p4, %p2330_p3 }
 0xf71   :  { %v1528_v21 = vadd.f32 %v1527_v16, %v1526_v13  ;;  %v1479_v22 = vmul.f32 4.0, %v1832_v20  ;;  %vm1483_vm3 = vweird.f32 %v1832_v20 }
 0xf72   :  { %p2333_p6 = pnand %p2332_p5, %p2328_p2 }
 0xf73   :  { %v1529_v24 = vrot.slane %v1528_v21, 2  ;;  %v1480_v25 = vsub.f32 1.0, %v1479_v22 }
 0xf75   :  { %v1530_v18 = vadd.f32 %v1529_v24, %v1528_v21  ;;  %v1481_v5 = vmul.f32 %v1832_v20, %v1480_v25 }
 0xf77   :  { %v1531_v30 = vrot.slane %v1530_v18, 1  ;;  %v1482_v32 = vadd.f32 %v1832_v20, %v1481_v5 }
 0xf79   :  { %v1532_v35 = vadd.f32 %v1531_v30, %v1530_v18  ;;  %v1484_v36 = vsel %vm1483_vm3, %v1832_v20, %v1482_v32 }
 0xf7b   :  { %v1533_v38 = vmul.f32 %v1532_v35, %v1484_v36 }
 0xfcb   :  { %v1461_v14 = vpop.xlane.xlu0 %1460 }
 0xfcc   :  { %v1469_v23 = vmul.f32 %v2892_v47, %v1461_v14 }
 0xfce   :  { %v1470_v26 = vmul.f32 0.5, %v1469_v23 }
 0xfd0   :  { %v1471_v27 = vsel %vm648_vm5, %v1470_v26, 0.0  ;;  %vm1546_vm5 = vcmask 0  }
 0xfd1   :  { %v1472_v1 = vrot.slane %v1471_v27, 4 }
 0xfd3   :  { %v1473_v29 = vadd.f32 %v1472_v1, %v1471_v27 }
 0xfd5   :  { %v1474_v31 = vrot.slane %v1473_v29, 2 }
 0xfd7   :  { %v1475_v34 = vadd.f32 %v1474_v31, %v1473_v29 }
 0xfd9   :  { %v1476_v15 = vrot.slane %v1475_v34, 1 }
 0xfdb   :  { %v1477_v37 = vadd.f32 %v1476_v15, %v1475_v34 }
 0xfdd   :  { %v1485_v39 = vmul.f32 %v1484_v36, %v1477_v37 }
 0xfdf   :  { %v1545_v40 = vadd.f32 %v1533_v38, %v1485_v39 }
 0xfe1   :  { %1547 = vst.msk [vmem:[#allocation35] sm:$0x1] %vm1546_vm5, %v1545_v40 }
 0xfe2   :  { %2336 = shalt.err (!%p2333_p6)
}
 0xfe3   :  { %1580 = dma.vmem_to_hbm [thread:$0]  %s1576_s29, 16, %s1578_s12, [#allocation34]  }
 0xfe4   :  { %2357 = dma.done.wait [#allocation5], 64  }
 0xfe5   :  { %2358 = vsyncadd [#allocation5], 4294967232 }
 0xfe6   :  { %2359 = dma.done.wait [#allocation34], 80  }
 0xfe7   :  { %2360 = vsyncadd [#allocation34], 4294967216 }
 0xfe8   :  { %1593 = vsyncpa [#allocation4], 1 }
 0xfe9   :  { %1594 = vsyncpa [#allocation7], 1 }
 0xfea   :  { %1595 = vsyncpa [#allocation10], 1 }
 0xfeb   :  { %1596 = vsyncpa [#allocation13], 1 }
 0xfec   :  { %1597 = vsyncpa [#allocation16], 1 }
 0xfed   :  { %1598 = vsyncpa [#allocation19], 1 }
 0xfee   :  { %1599 = vsyncpa [#allocation22], 1 }
 0xfef   :  { %1600 = vsyncpa [#allocation25], 1 }
 0xff0   :  { %1601 = vsyncpa [#allocation28], 1 }
 0xff1   :  { %1602 = vsyncpa [#allocation31], 1 }
 0xff2   :  { %1603 = vsyncpa [#allocation5], 1 }
 0xff3   :  { %1604 = vsyncpa [#allocation34], 1 }

</bundles_post_ra>
